<compile_context>
chip_gen: v6e
topology: v6e:2x2x1
jax: 0.10.0
libtpu: 0.0.40
codegen_flags: <defaults>
</compile_context>

<pallas_src>
import jax
import jax.numpy as jnp
from jax.experimental import pallas as pl
from jax.experimental.pallas import tpu as pltpu


# ------------------------------ helpers ----------------------------------- #
def _round_up(x, m):
    return (x + m - 1) // m * m


def _pick_tiles(nt_pad):
    """Row tile (TM) and contraction tile (TK) that divide nt_pad."""
    tm = 256 if nt_pad % 256 == 0 else 128
    tk = 128
    for cand in (2048, 1024, 512, 256):
        if nt_pad % cand == 0:
            tk = cand
            break
    return min(tm, nt_pad), min(tk, nt_pad)


# ----------------------------- Pallas kernel ------------------------------ #
def _tgcn_kernel(a_ref, xw_ref, h_ref, lzr_ref, lhh_ref, b_ref,
                 out_ref, acc_ref):
    """One (row-tile, K-tile) grid step.

    a_ref   : [TM, TK]        bf16/f32  normalized adjacency block
    xw_ref  : [TK, 3*Fp]      bf16/f32  (X @ Wcat) block (gates concat on lanes)
    h_ref   : [TM, Fp]        f32       hidden-state row tile
    lzr_ref : [Fp, 2*Fp]      f32       [lin_z_wh | lin_r_wh] (padded)
    lhh_ref : [Fp, Fp]        f32       lin_h_wh (padded)
    b_ref   : [1, 3*Fp]       f32       folded biases for z|r|h
    out_ref : [TM, Fp]        f32       new hidden state row tile
    acc_ref : [TM, 3*Fp]      f32       VMEM accumulator across K tiles
    """
    k = pl.program_id(1)

    @pl.when(k == 0)
    def _init():
        acc_ref[...] = jnp.zeros_like(acc_ref)

    # The dominant matmul: aggregation of all three (folded) gates at once.
    acc_ref[...] += jnp.dot(a_ref[...], xw_ref[...],
                            preferred_element_type=jnp.float32)

    @pl.when(k == pl.num_programs(1) - 1)
    def _finalize():
        fp = out_ref.shape[-1]
        agg = acc_ref[...] + b_ref[...]                       # [TM, 3*Fp]
        h = h_ref[...]                                        # [TM, Fp]
        hl = jnp.dot(h, lzr_ref[...],
                     preferred_element_type=jnp.float32)      # [TM, 2*Fp]

        z = jax.nn.sigmoid(agg[:, :fp] + hl[:, :fp])
        r = jax.nn.sigmoid(agg[:, fp:2 * fp] + hl[:, fp:])
        h_tilde = jnp.tanh(
            agg[:, 2 * fp:]
            + jnp.dot(h * r, lhh_ref[...],
                      preferred_element_type=jnp.float32))

        out_ref[...] = z * h + (1.0 - z) * h_tilde


# ------------------------------ JAX glue ---------------------------------- #
def gcn_norm_dense(edge_index, edge_weight, num_nodes,
                   improved=False, add_self_loops=True):
    """Dense D^{-1/2} (A + I) D^{-1/2} exactly as PyG's gcn_norm."""
    if edge_weight is None:
        edge_weight = jnp.ones((edge_index.shape[1],), jnp.float32)
    ei = edge_index
    ew = edge_weight.astype(jnp.float32)
    if add_self_loops:
        fill = 2.0 if improved else 1.0
        loops = jnp.stack([jnp.arange(num_nodes), jnp.arange(num_nodes)])
        ei = jnp.concatenate([ei, loops], axis=1)
        ew = jnp.concatenate([ew, jnp.full((num_nodes,), fill, jnp.float32)])
    row, col = ei[0], ei[1]
    deg = jnp.zeros((num_nodes,), jnp.float32).at[col].add(ew)
    dinv = jnp.where(deg > 0, deg ** -0.5, 0.0)
    norm = dinv[row] * ew * dinv[col]
    # out[col] += norm * x[row]  =>  A_norm[col, row] += norm
    A = jnp.zeros((num_nodes, num_nodes), jnp.float32).at[col, row].add(norm)
    return A


def init_tgcn_params(key, in_channels, out_channels):
    def glorot(k, shape):
        lim = (6.0 / (shape[0] + shape[1])) ** 0.5
        return jax.random.uniform(k, shape, jnp.float32, -lim, lim)

    ks = jax.random.split(key, 9)
    p = {}
    for i, g in enumerate("zrh"):
        p[f"conv_{g}_w"] = glorot(ks[3 * i], (in_channels, out_channels))
        p[f"conv_{g}_b"] = jnp.zeros((1, out_channels), jnp.float32)
        wl = glorot(ks[3 * i + 1], (2 * out_channels, out_channels))
        p[f"lin_{g}_wc"] = wl[:out_channels]          # acts on conv output
        p[f"lin_{g}_wh"] = wl[out_channels:]          # acts on hidden state
        p[f"lin_{g}_b"] = jax.random.uniform(
            ks[3 * i + 2], (1, out_channels), jnp.float32, -0.1, 0.1)
    return p


def tgcn_forward(params, X, edge_index, edge_weight=None, H=None,
                 improved=False, add_self_loops=True,
                 compute_dtype=jnp.bfloat16):
    """X: [B, N, F_in]; edge_index indexes the flattened B*N node set."""
    B, N, F_in = X.shape
    F_out = params["conv_z_w"].shape[1]
    NT = B * N
    if H is None:
        H = jnp.zeros((B, N, F_out), jnp.float32)

    Fp = _round_up(F_out, 128)            # lane-dense gate width
    NT_pad = _round_up(NT, 128)
    TM, TK = _pick_tiles(NT_pad)

    # Dense normalized adjacency (zero-padded rows/cols are inert).
    A = gcn_norm_dense(edge_index, edge_weight, NT,
                       improved=improved, add_self_loops=add_self_loops)
    A_pad = jnp.zeros((NT_pad, NT_pad), jnp.float32).at[:NT, :NT].set(A)

    # Fold gate linears into GCN weights and concatenate gates along lanes.
    Wcat = jnp.zeros((F_in, 3 * Fp), jnp.float32)
    bcat = jnp.zeros((1, 3 * Fp), jnp.float32)
    for g_idx, g in enumerate("zrh"):
        w_fold = params[f"conv_{g}_w"] @ params[f"lin_{g}_wc"]
        b_fold = params[f"conv_{g}_b"] @ params[f"lin_{g}_wc"] \
            + params[f"lin_{g}_b"]
        col = g_idx * Fp
        Wcat = Wcat.at[:, col:col + F_out].set(w_fold)
        bcat = bcat.at[:, col:col + F_out].set(b_fold)
    lzr = jnp.zeros((Fp, 2 * Fp), jnp.float32)
    lzr = lzr.at[:F_out, :F_out].set(params["lin_z_wh"])
    lzr = lzr.at[:F_out, Fp:Fp + F_out].set(params["lin_r_wh"])
    lhh = jnp.zeros((Fp, Fp), jnp.float32)
    lhh = lhh.at[:F_out, :F_out].set(params["lin_h_wh"])

    Xf = X.reshape(NT, F_in).astype(jnp.float32)
    Hf = H.reshape(NT, F_out).astype(jnp.float32)
    X_pad = jnp.zeros((NT_pad, F_in), jnp.float32).at[:NT].set(Xf)
    H_pad = jnp.zeros((NT_pad, Fp), jnp.float32).at[:NT, :F_out].set(Hf)

    # Tiny GEMM done once outside the kernel; the kernel owns the big
    # A @ (X @ Wcat) aggregation, the hidden-state matmuls and the gating.
    XW = (X_pad @ Wcat).astype(compute_dtype)
    A_c = A_pad.astype(compute_dtype)

    grid = (NT_pad // TM, NT_pad // TK)
    itemsize = jnp.dtype(compute_dtype).itemsize
    cost = pl.CostEstimate(
        flops=(2 * NT_pad * NT_pad * 3 * Fp            # A @ XW
               + 2 * NT_pad * Fp * 2 * Fp              # H @ [lzh|lrh]
               + 2 * NT_pad * Fp * Fp),                # (H*R) @ lhh
        transcendentals=3 * NT_pad * Fp,
        bytes_accessed=(NT_pad * NT_pad * itemsize
                        + NT_pad * 3 * Fp * itemsize
                        + 2 * NT_pad * Fp * 4
                        + (lzr.size + lhh.size + bcat.size) * 4))

    out_pad = pl.pallas_call(
        _tgcn_kernel,
        out_shape=jax.ShapeDtypeStruct((NT_pad, Fp), jnp.float32),
        grid_spec=pltpu.PrefetchScalarGridSpec(
            num_scalar_prefetch=0,
            grid=grid,
            in_specs=[
                pl.BlockSpec((TM, TK), lambda i, k: (i, k)),        # A
                pl.BlockSpec((TK, 3 * Fp), lambda i, k: (k, 0)),    # X @ Wcat
                pl.BlockSpec((TM, Fp), lambda i, k: (i, 0)),        # H
                pl.BlockSpec((Fp, 2 * Fp), lambda i, k: (0, 0)),    # [lzh|lrh]
                pl.BlockSpec((Fp, Fp), lambda i, k: (0, 0)),        # lhh
                pl.BlockSpec((1, 3 * Fp), lambda i, k: (0, 0)),     # biases
            ],
            out_specs=pl.BlockSpec((TM, Fp), lambda i, k: (i, 0)),
            scratch_shapes=[pltpu.VMEM((TM, 3 * Fp), jnp.float32)],
        ),
        compiler_params=pltpu.CompilerParams(
            dimension_semantics=("parallel", "arbitrary")),
        cost_estimate=cost,
    )(A_c, XW, H_pad, lzr, lhh, bcat)

    return out_pad[:NT, :F_out].reshape(B, N, F_out)


# Pure-JAX reference (mirrors the PyTorch module, no folding) for sanity check.
def tgcn_reference(params, X, edge_index, edge_weight=None, H=None):
    B, N, F_in = X.shape
    F_out = params["conv_z_w"].shape[1]
    NT = B * N
    if H is None:
        H = jnp.zeros((B, N, F_out), jnp.float32)
    A = gcn_norm_dense(edge_index, edge_weight, NT)
    Xf = X.reshape(NT, F_in)
    Hf = H.reshape(NT, F_out)

    def gcn(g):
        return A @ (Xf @ params[f"conv_{g}_w"]) + params[f"conv_{g}_b"]

    Z = jax.nn.sigmoid(gcn("z") @ params["lin_z_wc"]
                       + Hf @ params["lin_z_wh"] + params["lin_z_b"])
    R = jax.nn.sigmoid(gcn("r") @ params["lin_r_wc"]
                       + Hf @ params["lin_r_wh"] + params["lin_r_b"])
    Ht = jnp.tanh(gcn("h") @ params["lin_h_wc"]
                  + (Hf * R) @ params["lin_h_wh"] + params["lin_h_b"])
    return (Z * Hf + (1.0 - Z) * Ht).reshape(B, N, F_out)


if __name__ == "__main__":
    key = jax.random.PRNGKey(0)
    k_param, k_x, k_h, k_w = jax.random.split(key, 4)

    # Small but multi-tile: NT = 320 -> padded 384 -> 3x3 grid of 128-tiles.
    B, N, F_in, F_out = 2, 160, 4, 8
    NT = B * N

    params = init_tgcn_params(k_param, F_in, F_out)
    X = jax.random.normal(k_x, (B, N, F_in), jnp.float32)
    H0 = jax.random.normal(k_h, (B, N, F_out), jnp.float32)

    # Deterministic ring graph over the flattened B*N node set (both directions).
    src = jnp.arange(NT)
    dst = (src + 1) % NT
    edge_index = jnp.concatenate(
        [jnp.stack([src, dst]), jnp.stack([dst, src])], axis=1).astype(jnp.int32)
    edge_weight = jax.random.uniform(k_w, (edge_index.shape[1],), jnp.float32,
                                     0.5, 1.5)

    ref = tgcn_reference(params, X, edge_index, edge_weight, H0)

    # f32 aggregation path: tight check (weight folding only re-associates).
    out_f32 = jax.block_until_ready(
        tgcn_forward(params, X, edge_index, edge_weight, H0,
                     compute_dtype=jnp.float32))
    assert out_f32.shape == (B, N, F_out)
    assert jnp.allclose(out_f32, ref, atol=2e-4, rtol=2e-4), "f32 mismatch"

    # Default bf16 aggregation path (f32 accumulation): relaxed tolerance.
    out_bf16 = jax.block_until_ready(
        tgcn_forward(params, X, edge_index, edge_weight, H0,
                     compute_dtype=jnp.bfloat16))
    assert out_bf16.shape == (B, N, F_out)
    assert jnp.allclose(out_bf16, ref, atol=5e-2, rtol=5e-2), "bf16 mismatch"

    print("KERNEL_OK")
</pallas_src>

<mosaic_0001>
module attributes {stable_mosaic.version = 11 : i64} {
  func.func @_tgcn_kernel(%arg0: i32, %arg1: i32, %arg2: memref<128x128xf32, #tpu.memory_space<vmem>>, %arg3: memref<128x384xf32, #tpu.memory_space<vmem>>, %arg4: memref<128x128xf32, #tpu.memory_space<vmem>>, %arg5: memref<128x256xf32, #tpu.memory_space<vmem>>, %arg6: memref<128x128xf32, #tpu.memory_space<vmem>>, %arg7: memref<1x384xf32, #tpu.memory_space<vmem>>, %arg8: memref<128x128xf32, #tpu.memory_space<vmem>>, %arg9: memref<128x384xf32, #tpu.memory_space<vmem>>) attributes {dimension_semantics = [#tpu.dimension_semantics<parallel>, #tpu.dimension_semantics<arbitrary>], iteration_bounds = array<i64: 3, 3>, scalar_prefetch = 0 : i64, scratch_operands = 1 : i64, tpu.core_type = #tpu.core_type<tc>, window_params = [{transform_indices = @transform_0, window_bounds = array<i64: 128, 128>}, {transform_indices = @transform_1, window_bounds = array<i64: 128, 384>}, {transform_indices = @transform_2, window_bounds = array<i64: 128, 128>}, {pipeline_mode = #tpu.pipeline_mode<synchronous>, transform_indices = @transform_3, window_bounds = array<i64: 128, 256>}, {pipeline_mode = #tpu.pipeline_mode<synchronous>, transform_indices = @transform_4, window_bounds = array<i64: 128, 128>}, {pipeline_mode = #tpu.pipeline_mode<synchronous>, transform_indices = @transform_5, window_bounds = array<i64: 1, 384>}, {transform_indices = @transform_6, window_bounds = array<i64: 128, 128>}]} {
    %c0_i32 = arith.constant 0 : i32
    %0 = arith.cmpi eq, %arg1, %c0_i32 : i32
    %1 = arith.extui %0 : i1 to i32
    %c0_i32_0 = arith.constant 0 : i32
    %2 = arith.cmpi ne, %1, %c0_i32_0 : i32
    scf.if %2 {
      %cst_9 = arith.constant 0.000000e+00 : f32
      %12 = vector.broadcast %cst_9 : f32 to vector<128x384xf32>
      %c0_10 = arith.constant 0 : index
      %c0_11 = arith.constant 0 : index
      %13 = vector.load %arg9[%c0_10, %c0_11] : memref<128x384xf32, #tpu.memory_space<vmem>>, vector<128x384xf32>
      tpu.vector_store %arg9[%c0_10, %c0_11], %12 {strides = array<i32>} : memref<128x384xf32, #tpu.memory_space<vmem>>, vector<128x384xf32>,
    } else {
    }
    %c0 = arith.constant 0 : index
    %c0_1 = arith.constant 0 : index
    %3 = vector.load %arg9[%c0, %c0_1] : memref<128x384xf32, #tpu.memory_space<vmem>>, vector<128x384xf32>
    %c0_2 = arith.constant 0 : index
    %c0_3 = arith.constant 0 : index
    %4 = vector.load %arg2[%c0_2, %c0_3] : memref<128x128xf32, #tpu.memory_space<vmem>>, vector<128x128xf32>
    %c0_4 = arith.constant 0 : index
    %c0_5 = arith.constant 0 : index
    %5 = vector.load %arg3[%c0_4, %c0_5] : memref<128x384xf32, #tpu.memory_space<vmem>>, vector<128x384xf32>
    %cst = arith.constant dense<0.000000e+00> : vector<128x384xf32>
    %6 = tpu.matmul %4, %5, %cst {dimension_numbers = #tpu.dot_dimension_numbers<[1], [0], [0], [1], [0, 0, 1, 1], [], []>} : vector<128x128xf32>, vector<128x384xf32>, vector<128x384xf32> -> vector<128x384xf32>
    %7 = arith.addf %3, %6 : vector<128x384xf32>
    %c0_6 = arith.constant 0 : index
    %c0_7 = arith.constant 0 : index
    %8 = vector.load %arg9[%c0_6, %c0_7] : memref<128x384xf32, #tpu.memory_space<vmem>>, vector<128x384xf32>
    tpu.vector_store %arg9[%c0_6, %c0_7], %7 {strides = array<i32>} : memref<128x384xf32, #tpu.memory_space<vmem>>, vector<128x384xf32>,
    %c2_i32 = arith.constant 2 : i32
    %9 = arith.cmpi eq, %arg1, %c2_i32 : i32
    %10 = arith.extui %9 : i1 to i32
    %c0_i32_8 = arith.constant 0 : i32
    %11 = arith.cmpi ne, %10, %c0_i32_8 : i32
    scf.if %11 {
      %c0_9 = arith.constant 0 : index
      %c0_10 = arith.constant 0 : index
      %12 = vector.load %arg9[%c0_9, %c0_10] : memref<128x384xf32, #tpu.memory_space<vmem>>, vector<128x384xf32>
      %c0_11 = arith.constant 0 : index
      %c0_12 = arith.constant 0 : index
      %13 = vector.load %arg7[%c0_11, %c0_12] : memref<1x384xf32, #tpu.memory_space<vmem>>, vector<1x384xf32>
      %14 = vector.broadcast %13 : vector<1x384xf32> to vector<128x384xf32>
      %15 = arith.addf %12, %14 : vector<128x384xf32>
      %c0_13 = arith.constant 0 : index
      %c0_14 = arith.constant 0 : index
      %16 = vector.load %arg4[%c0_13, %c0_14] : memref<128x128xf32, #tpu.memory_space<vmem>>, vector<128x128xf32>
      %c0_15 = arith.constant 0 : index
      %c0_16 = arith.constant 0 : index
      %17 = vector.load %arg5[%c0_15, %c0_16] : memref<128x256xf32, #tpu.memory_space<vmem>>, vector<128x256xf32>
      %cst_17 = arith.constant dense<0.000000e+00> : vector<128x256xf32>
      %18 = tpu.matmul %16, %17, %cst_17 {dimension_numbers = #tpu.dot_dimension_numbers<[1], [0], [0], [1], [0, 0, 1, 1], [], []>} : vector<128x128xf32>, vector<128x256xf32>, vector<128x256xf32> -> vector<128x256xf32>
      %19 = vector.extract_strided_slice %15 {offsets = [0, 0], sizes = [128, 128], strides = [1, 1]} : vector<128x384xf32> to vector<128x128xf32>
      %20 = vector.extract_strided_slice %18 {offsets = [0, 0], sizes = [128, 128], strides = [1, 1]} : vector<128x256xf32> to vector<128x128xf32>
      %21 = arith.addf %19, %20 : vector<128x128xf32>
      %22 = arith.negf %21 : vector<128x128xf32>
      %23 = math.exp %22 : vector<128x128xf32>
      %cst_18 = arith.constant 1.000000e+00 : f32
      %24 = vector.broadcast %cst_18 : f32 to vector<128x128xf32>
      %25 = arith.addf %24, %23 : vector<128x128xf32>
      %26 = arith.divf %24, %25 : vector<128x128xf32>
      %27 = vector.extract_strided_slice %15 {offsets = [0, 128], sizes = [128, 128], strides = [1, 1]} : vector<128x384xf32> to vector<128x128xf32>
      %28 = vector.extract_strided_slice %18 {offsets = [0, 128], sizes = [128, 128], strides = [1, 1]} : vector<128x256xf32> to vector<128x128xf32>
      %29 = arith.addf %27, %28 : vector<128x128xf32>
      %30 = arith.negf %29 : vector<128x128xf32>
      %31 = math.exp %30 : vector<128x128xf32>
      %cst_19 = arith.constant 1.000000e+00 : f32
      %32 = vector.broadcast %cst_19 : f32 to vector<128x128xf32>
      %33 = arith.addf %32, %31 : vector<128x128xf32>
      %34 = arith.divf %32, %33 : vector<128x128xf32>
      %35 = vector.extract_strided_slice %15 {offsets = [0, 256], sizes = [128, 128], strides = [1, 1]} : vector<128x384xf32> to vector<128x128xf32>
      %36 = arith.mulf %16, %34 : vector<128x128xf32>
      %c0_20 = arith.constant 0 : index
      %c0_21 = arith.constant 0 : index
      %37 = vector.load %arg6[%c0_20, %c0_21] : memref<128x128xf32, #tpu.memory_space<vmem>>, vector<128x128xf32>
      %cst_22 = arith.constant dense<0.000000e+00> : vector<128x128xf32>
      %38 = tpu.matmul %36, %37, %cst_22 {dimension_numbers = #tpu.dot_dimension_numbers<[1], [0], [0], [1], [0, 0, 1, 1], [], []>} : vector<128x128xf32>, vector<128x128xf32>, vector<128x128xf32> -> vector<128x128xf32>
      %39 = arith.addf %35, %38 : vector<128x128xf32>
      %40 = math.tanh %39 : vector<128x128xf32>
      %41 = arith.mulf %26, %16 : vector<128x128xf32>
      %cst_23 = arith.constant 1.000000e+00 : f32
      %42 = vector.broadcast %cst_23 : f32 to vector<128x128xf32>
      %43 = arith.subf %42, %26 : vector<128x128xf32>
      %44 = arith.mulf %43, %40 : vector<128x128xf32>
      %45 = arith.addf %41, %44 : vector<128x128xf32>
      %c0_24 = arith.constant 0 : index
      %c0_25 = arith.constant 0 : index
      %46 = vector.load %arg8[%c0_24, %c0_25] : memref<128x128xf32, #tpu.memory_space<vmem>>, vector<128x128xf32>
      tpu.vector_store %arg8[%c0_24, %c0_25], %45 {strides = array<i32>} : memref<128x128xf32, #tpu.memory_space<vmem>>, vector<128x128xf32>,
    } else {
    }
    return
  }
  func.func @transform_0(%arg0: i32, %arg1: i32) -> (i32, i32) {
    %c0_i32 = arith.constant 0 : i32
    return %arg0, %arg1 : i32, i32
  }
  func.func @transform_1(%arg0: i32, %arg1: i32) -> (i32, i32) {
    %c0_i32 = arith.constant 0 : i32
    %c0_i32_0 = arith.constant 0 : i32
    return %arg1, %c0_i32 : i32, i32
  }
  func.func @transform_2(%arg0: i32, %arg1: i32) -> (i32, i32) {
    %c0_i32 = arith.constant 0 : i32
    %c0_i32_0 = arith.constant 0 : i32
    return %arg0, %c0_i32 : i32, i32
  }
  func.func @transform_3(%arg0: i32, %arg1: i32) -> (i32, i32) {
    %c0_i32 = arith.constant 0 : i32
    %c0_i32_0 = arith.constant 0 : i32
    %c0_i32_1 = arith.constant 0 : i32
    return %c0_i32, %c0_i32_0 : i32, i32
  }
  func.func @transform_4(%arg0: i32, %arg1: i32) -> (i32, i32) {
    %c0_i32 = arith.constant 0 : i32
    %c0_i32_0 = arith.constant 0 : i32
    %c0_i32_1 = arith.constant 0 : i32
    return %c0_i32, %c0_i32_0 : i32, i32
  }
  func.func @transform_5(%arg0: i32, %arg1: i32) -> (i32, i32) {
    %c0_i32 = arith.constant 0 : i32
    %c0_i32_0 = arith.constant 0 : i32
    %c0_i32_1 = arith.constant 0 : i32
    return %c0_i32, %c0_i32_0 : i32, i32
  }
  func.func @transform_6(%arg0: i32, %arg1: i32) -> (i32, i32) {
    %c0_i32 = arith.constant 0 : i32
    %c0_i32_0 = arith.constant 0 : i32
    return %arg0, %c0_i32 : i32, i32
  }
}

</mosaic_0001>

<bundles_post_ra>
// kernel: tpu_custom_call.1
= control target key start
LH: loop header
LB: loop body
LE: loop exit
PB: predicated region body
PF: predicated region fallthrough
CT: control target
= control target key end

     0   :  { %s3592_s0 = inlined_call_operand.hbm [shape: f32[384,384], index: 0, kind: input, shape index: {}]   ;;  %s3593_s1 = inlined_call_operand.hbm [shape: f32[384,384], index: 1, kind: input, shape index: {}]   ;;  %s3594_s2 = inlined_call_operand.hbm [shape: f32[384,128], index: 2, kind: input, shape index: {}]   ;;  %s3595_s3 = inlined_call_operand.hbm [shape: f32[128,256], index: 3, kind: input, shape index: {}]   ;;  %s3596_s4 = inlined_call_operand.hbm [shape: f32[128,128], index: 4, kind: input, shape index: {}]   ;;  %s3597_s5 = inlined_call_operand.vmem [shape: f32[1,384], index: 5, kind: input, shape index: {}]   ;;  %s3598_s6 = inlined_call_operand.hbm [shape: f32[384,128], index: 6, kind: output, shape index: {}]  }
   0x1   :  { %3616 = sst [smem:[#allocation27_spill]] %s3592_s0 }
   0x2   :  { %3617 = sst [smem:[#allocation28_spill]] %s3595_s3 }
   0x3   :  { %3618 = sst [smem:[#allocation29_spill]] %s3597_s5 }
   0x4   :  { %3619 = sst [smem:[#allocation30_spill]] %s3598_s6 }
   0x5   :  { %11 = vsyncpa [#allocation4], 0 }
   0x6   :  { %13 = vsyncpa [#allocation4 + $0x1], 0 }
   0x7   :  { %14 = vsyncpa [#allocation7], 0 }
   0x8   :  { %16 = vsyncpa [#allocation7 + $0x1], 0 }
   0x9   :  { %17 = vsyncpa [#allocation10], 0 }
   0xa   :  { %18 = vsyncpa [#allocation5], 0 }
   0xb   :  { %20 = vsyncpa [#allocation5 + $0x1], 0  ;;  %s2890_s21 = smov 0   ;;  %s2892_s22 = smov 0  }
   0xc   :  { %s2894_s23 = smov 0   ;;  %s2896_s24 = smov 0  }
   0xd   :  { %s2898_s25 = smov 0   ;;  %s2900_s26 = smov 0  }
   0xe   :  { %s2902_s27 = smov 0   ;;  %s2904_s28 = smov 0  }
   0xf   :  { %s2906_s29 = smov 0   ;;  %s2908_s30 = smov 0  }
  0x10   :  { %s2910_s7 = smov 0   ;;  %s2912_s8 = smov 0  }
  0x11   :  { %s2914_s9 = smov 0   ;;  %s2916_s10 = smov 0  }
  0x12 LB: > { %3620 = sst [smem:[#allocation18_spill]] %s2800_s25  ;;  %s2961_s11 = sadd.s32 4294967295, %s2836_s10   ;;  %s2836_s10 = sphi %s2916_s10, %s26_s10   ;;  %s2832_s9 = sphi %s2914_s9, %s3684_s9   ;;  %s2828_s8 = sphi %s2912_s8, %s3683_s8   ;;  %s2824_s7 = sphi %s2910_s7, %s3682_s7   ;;  %s2820_s30 = sphi %s2908_s30, %s3681_s30   ;;  %s2816_s29 = sphi %s2906_s29, %s3680_s29   ;;  %s2812_s28 = sphi %s2904_s28, %s3679_s28   ;;  %s2808_s27 = sphi %s2902_s27, %s3678_s27   ;;  %s2804_s26 = sphi %s2900_s26, %s3671_s26   ;;  %s2800_s25 = sphi %s2898_s25, %s3670_s25   ;;  %s2796_s24 = sphi %s2896_s24, %s3669_s24   ;;  %s2792_s23 = sphi %s2894_s23, %s3677_s23   ;;  %s2788_s22 = sphi %s2892_s22, %s3676_s22   ;;  %s2784_s21 = sphi %s2890_s21, %s3675_s21  }
  0x13   : > { %3621 = sst [smem:[#allocation19_spill]] %s2804_s26  ;;  %p1966_p0 = scmp.ge.s32.totalorder %s2836_s10, 1 }
  0x14   : > { %3622 = sst [smem:[#allocation20_spill]] %s2820_s30  ;;  %p3608_p1 = scmp.eq.s32.totalorder %s2961_s11, 0 }
  0x15   : > { %3623 = sst [smem:[#allocation21_spill]] %s2824_s7  ;;  %p212_p3 = scmp.lt.s32.totalorder %s2836_s10, 10 }
  0x16   : > { %s2838_s13 = smov [#allocation9]  }
  0x17   : > { %p2967_p4 = pnand %p1966_p0, %p212_p3  ;;  %s224_s14 = sshll.u32 %s2838_s13, 4  ;;  %s225_s14 = int_to_ptr.vmem [resolvable:$true] %s224_s14 }
  0x18   : > { %s2555_s16 = scalar_lea.vmem %s225_s14, 4096  ;;  %p2563_p11 = scmp.lt.s32.totalorder %s225_s14, %s225_s14 }
  0x19   : > { %s3624_s12 = scalar_select %p2967_p4, 1, 0 }
  0x1a   : > { %p2223_p5 = pneg %p2967_p4  ;;  %p2556_p8 = scmp.ne.s32.totalorder %s225_s14, %s2555_s16 }
  0x1b   : > { %3625 = sst [smem:[#allocation22_spill]] %s3624_s12  ;;  %p2564_p12 = scmp.lt.s32.totalorder %s2555_s16, %s2555_s16 }
  0x1c   : > { %p2975_p6 = pnand %p2223_p5, %p3608_p1 }
  0x1d   : > { %p2565_p13 = por %p2564_p12, %p2563_p11 }
  0x1e   : > { %p2546_p7 = pneg %p2975_p6 }
  0x20   : > { %p2558_p9 = pnand %p2556_p8, %p2546_p7 }
  0x22   : > { %p2559_p10 = pneg %p2558_p9 }
  0x24   : > { %p2566_p0 = pnand %p2565_p13, %p2559_p10 }
  0x26   : > { %2569 = shalt.err (!%p2566_p0)
}
  0x27   : > { %s2839_s17 = smov 256   ;;  %s2840_s18 = smov 16  }
  0x28   : > { %s3627_s3 = sld [smem:[#allocation28_spill]]  ;;  %s35_s13 = sadd.s32 1, %s2828_s8 }
  0x29   : > { %s38_s16 = sadd.s32 1, %s2832_s9  ;;  %p36_p3 = scmp.ge.s32.totalorder %s35_s13, 3 }
  0x2a   : > { %p3609_p5 = scmp.eq.s32.totalorder %s2836_s10, 0  ;;  %s73_s6 = sadd.s32 1, %s2804_s26 }
  0x2b   : > { %p80_p8 = scmp.ne.s32.totalorder %s2804_s26, %s2800_s25  ;;  %s3686_s13 = smov (%p36_p3, %s35_s13), 0 }
  0x2c   : > { %3628 = sst [smem:[#allocation23_spill]] %s3686_s13  ;;  %s3688_s16 = smov (!%p36_p3, %s38_s16), %s2832_s9 }
  0x2d   : > { %s43_s7 = ssub.s32 %s2828_s8, %s3686_s13  ;;  %p3002_p9 = por %p80_p8, %p3609_p5 }
  0x2e   : > { %2226 = dma.hbm_to_vmem [thread:$0]  (!%p2975_p6), %s3627_s3, 4096, %s225_s14, [#allocation10], %s2839_s17, %s2839_s17, %s2840_s18  }
  0x2f   : > { %p40_p10 = scmp.ge.s32.totalorder %s3688_s16, 3  ;;  %p71_p11 = scmp.eq.s32.totalorder %s43_s7, 0 }
  0x30   : > { %p86_p12 = scmp.ne.s32.totalorder %s2800_s25, %s2796_s24  ;;  %p3607_p13 = scmp.lt.s32.totalorder %s2836_s10, 9 }
  0x31   : > { %s3690_s16 = smov (%p40_p10, %s3688_s16), 0  ;;  %s277_s24 = sand.u32 1, %s2836_s10  }
  0x32   : > { %3630 = sst [smem:[#allocation24_spill]] %s3690_s16  ;;  %s3016_s18 = ssub.s32 %s2832_s9, %s3690_s16 }
  0x33   : > { %s3012_s17 = scalar_select %p71_p11, %s2804_s26, %s73_s6  }
  0x34   : > { %p3020_p0 = por %p86_p12, %p3608_p1  ;;  %s44_s20 = sor.u32 %s43_s7, %s3016_s18 }
  0x35   : > { %3631 = sst [smem:[#allocation25_spill]] %s3012_s17  ;;  %p3026_p8 = scmp.eq.s32.totalorder %s44_s20, 0 }
  0x36   : > { %s3632_s19 = scalar_select %p3020_p0, 1, 0 }
  0x37   : > { %s279_s13 = sand.u32 1, %s2804_s26   ;;  %s2205_s6 = smul.u32 6144, %s2828_s8 }
  0x38   : > { %3633 = sst [smem:[#allocation26_spill]] %s3632_s19  ;;  %s2204_s5 = smul.u32 384, %s279_s13 }
  0x39   : > { %p3037_p10 = pnand %p3607_p13, %p3002_p9  ;;  %s288_s7 = scalar_lea.hbm %s3593_s1, %s2205_s6 }
  0x3a   : > { %s281_s19 = scalar_lea.vmem [#allocation6], %s2204_s5  ;;  %s3044_s25 = scalar_lea.sflag [#allocation7], %s277_s24 }
  0x3b   : > { %s289_s20 = sshll.u32 %s281_s19, 4  ;;  %p2572_p11 = pneg %p3037_p10  ;;  %s290_s20 = int_to_ptr.vmem [resolvable:$true] %s289_s20 }
  0x3c   : > { %s2583_s13 = scalar_lea.vmem %s290_s20, 6144  ;;  %s2841_s14 = smov [#allocation6]  }
  0x3d   : > { %p2584_p12 = scmp.ne.s32.totalorder %s290_s20, %s2583_s13  ;;  %s2588_s26 = sshll.u32 %s2841_s14, 4  ;;  %s2589_s26 = int_to_ptr.vmem [resolvable:$false] %s2588_s26 }
  0x3e   : > { %s2590_s12 = scalar_lea.vmem %s2589_s26, 12288  ;;  %p2591_p9 = scmp.lt.s32.totalorder %s290_s20, %s2589_s26 }
  0x3f   : > { %p2586_p2 = pnand %p2584_p12, %p2572_p11  ;;  %p2592_p13 = scmp.lt.s32.totalorder %s2590_s12, %s2583_s13 }
  0x41   : > { %p2587_p3 = pneg %p2586_p2  ;;  %p2593_p1 = por %p2592_p13, %p2591_p9 }
  0x43   : > { %p2594_p5 = pnand %p2593_p1, %p2587_p3 }
  0x45   : > { %2597 = shalt.err (!%p2594_p5)
}
  0x46   : > { %s3610_s5 = smov 384   ;;  %s2843_s30 = smov 24  }
  0x47   : > { %2236 = dma.hbm_to_vmem [thread:$0]  (!%p3037_p10), %s288_s7, 6144, %s290_s20, %s3044_s25, %s3610_s5, %s3610_s5, %s2843_s30  }
  0x48   : > { %s2844_s17 = smov [#allocation11]  }
  0x49   : > { %s237_s19 = sshll.u32 %s2844_s17, 4  ;;  %s238_s19 = int_to_ptr.vmem [resolvable:$true] %s237_s19 }
  0x4a   : > { %s2609_s24 = scalar_lea.vmem %s238_s19, 2048  ;;  %p2617_p1 = scmp.lt.s32.totalorder %s238_s19, %s238_s19 }
  0x4b   : > { %p2610_p2 = scmp.ne.s32.totalorder %s238_s19, %s2609_s24  ;;  %p2618_p5 = scmp.lt.s32.totalorder %s2609_s24, %s2609_s24 }
  0x4d   : > { %p2612_p11 = pnand %p2610_p2, %p2546_p7  ;;  %p2619_p3 = por %p2618_p5, %p2617_p1 }
  0x4f   : > { %p2613_p13 = pneg %p2612_p11 }
  0x51   : > { %p2620_p12 = pnand %p2619_p3, %p2613_p13 }
  0x53   : > { %2623 = shalt.err (!%p2620_p12)
}
  0x54   : > { %s3611_s26 = smov 128   ;;  %s3613_s12 = smov 8  }
  0x55   : > { %2229 = dma.hbm_to_vmem [thread:$0]  (!%p2975_p6), %s3596_s4, 2048, %s238_s19, [#allocation10], %s3611_s26, %s3611_s26, %s3613_s12  }
  0x56   : > { %s47_s7 = sadd.s32 1, %s2816_s29  ;;  %p54_p7 = scmp.ne.s32.totalorder %s2816_s29, %s2812_s28 }
  0x57   : > { %s3068_s20 = scalar_select %p3026_p8, %s2816_s29, %s47_s7  }
  0x58   : > { %p60_p10 = scmp.ne.s32.totalorder %s2812_s28, %s2808_s27  ;;  %s254_s13 = sand.u32 1, %s2816_s29  }
  0x59   : > { %s2203_s14 = smul.u32 48, %s2832_s9  ;;  %p3636_p9 = scmp.eq.s32.totalorder %s2836_s10, 0 }
  0x5a   : > { %p3637_p11 = scmp.eq.s32.totalorder %s2961_s11, 0  ;;  %s1970_s30 = sshll.u32 %s254_s13, 7 }
  0x5b   : > { %p56_p2 = por %p3636_p9, %p54_p7  ;;  %s264_s17 = sadd.s32 %s2828_s8, %s2203_s14 }
  0x5c   : > { %p3080_p13 = por %p3637_p11, %p60_p10  ;;  %s1973_s24 = sshll.u32 %s264_s17, 7 }
  0x5d   : > { %s258_s19 = scalar_lea.vmem [#allocation3], %s1970_s30  ;;  %s3639_s0 = sld [smem:[#allocation27_spill]] }
  0x5e   : > { %s267_s16 = sshll.u32 %s258_s19, 4  ;;  %p3640_p6 = scmp.lt.s32.totalorder %s2836_s10, 9  ;;  %s268_s16 = int_to_ptr.vmem [resolvable:$true] %s267_s16 }
  0x5f   : > { %s255_s5 = scalar_lea.sflag [#allocation4], %s254_s13  ;;  %s2637_s26 = scalar_lea.vmem %s268_s16, 2048 }
  0x60   : > { %p3090_p8 = pnand %p3640_p6, %p56_p2  ;;  %p2638_p5 = scmp.ne.s32.totalorder %s268_s16, %s2637_s26 }
  0x61   : > { %s2847_s14 = smov [#allocation3]  }
  0x62   : > { %p2626_p1 = pneg %p3090_p8  ;;  %s2642_s30 = sshll.u32 %s2847_s14, 4  ;;  %s2643_s30 = int_to_ptr.vmem [resolvable:$false] %s2642_s30 }
  0x63   : > { %s266_s7 = scalar_lea.hbm %s3639_s0, %s1973_s24  ;;  %s2644_s17 = scalar_lea.vmem %s2643_s30, 4096 }
  0x64   : > { %p2640_p3 = pnand %p2638_p5, %p2626_p1  ;;  %p2645_p7 = scmp.lt.s32.totalorder %s268_s16, %s2643_s30 }
  0x65   : > { %p2646_p10 = scmp.lt.s32.totalorder %s2644_s17, %s2637_s26 }
  0x66   : > { %p2641_p12 = pneg %p2640_p3 }
  0x67   : > { %p2647_p9 = por %p2646_p10, %p2645_p7 }
  0x69   : > { %p2648_p11 = pnand %p2647_p9, %p2641_p12 }
  0x6b   : > { %2651 = shalt.err (!%p2648_p11)
}
  0x6c   : > { %s3642_s24 = smov 128   ;;  %s3643_s13 = smov 384  }
  0x6d   : > { %2233 = dma.hbm_to_vmem [thread:$0]  (!%p3090_p8), %s266_s7, 2048, %s268_s16, %s255_s5, %s3643_s13, %s3642_s24, %s3613_s12  }
  0x6e   : > { %s1965_s26 = sadd.s32 4294967294, %s2836_s10   ;;  %s99_s19 = sadd.s32 1, %s2792_s23 }
  0x6f   : > { %p3644_p2 = scmp.eq.s32.totalorder %s3016_s18, 0  ;;  %p106_p6 = scmp.ne.s32.totalorder %s2792_s23, %s2788_s22 }
  0x70   : > { %p112_p1 = scmp.ne.s32.totalorder %s2788_s22, %s2784_s21  ;;  %p205_p5 = scmp.eq.s32.totalorder %s1965_s26, 8 }
  0x71   : > { %s3106_s6 = scalar_select %p3644_p2, %s2792_s23, %s99_s19  }
  0x72   : > { %s301_s3 = sand.u32 1, %s2792_s23   ;;  %p3645_p3 = scmp.eq.s32.totalorder %s2836_s10, 0 }
  0x73   : > { %p3646_p7 = scmp.eq.s32.totalorder %s2961_s11, 0  ;;  %p3648_p9 = scmp.eq.s32.totalorder %s2961_s11, 8 }
  0x74   : > { %p108_p12 = por %p106_p6, %p3645_p3  ;;  %p3127_p8 = por %p205_p5, %p112_p1 }
  0x75   : > { %p3117_p10 = por %p112_p1, %p3646_p7  ;;  %p3123_p11 = por %p3648_p9, %p106_p6 }
  0x76   : > { %s3650_s18 = scalar_select %p3127_p8, 1, 0 }
  0x77   : > { %s3647_s27 = scalar_select %p3117_p10, 1, 0 }
  0x78   : > { %s3649_s5 = scalar_select %p3123_p11, 1, 0 }
  0x79   : > { %s1977_s16 = sshll.u32 %s301_s3, 7  ;;  %s2025_s7 = sshll.u32 %s2832_s9, 11 }
  0x7a   : > { %s309_s17 = scalar_lea.hbm %s3594_s2, %s2025_s7  ;;  %s303_s13 = scalar_lea.vmem [#allocation8], %s1977_s16 }
  0x7b   : > { %s310_s26 = sshll.u32 %s303_s13, 4  ;;  %p3651_p2 = scmp.lt.s32.totalorder %s2836_s10, 9  ;;  %s311_s26 = int_to_ptr.vmem [resolvable:$true] %s310_s26 }
  0x7c   : > { %s2665_s12 = scalar_lea.vmem %s311_s26, 2048  ;;  %s2848_s3 = smov [#allocation8]  }
  0x7d   : > { %p3137_p3 = pnand %p3651_p2, %p108_p12  ;;  %p2666_p1 = scmp.ne.s32.totalorder %s311_s26, %s2665_s12 }
  0x7e   : > { %s2670_s0 = sshll.u32 %s2848_s3, 4  ;;  %s2671_s0 = int_to_ptr.vmem [resolvable:$false] %s2670_s0 }
  0x7f   : > { %p2654_p6 = pneg %p3137_p3  ;;  %s2672_s14 = scalar_lea.vmem %s2671_s0, 4096 }
  0x80   : > { %p2673_p9 = scmp.lt.s32.totalorder %s311_s26, %s2671_s0  ;;  %p2674_p8 = scmp.lt.s32.totalorder %s2672_s14, %s2665_s12 }
  0x81   : > { %p2668_p5 = pnand %p2666_p1, %p2654_p6 }
  0x82   : > { %p2675_p11 = por %p2674_p8, %p2673_p9 }
  0x83   : > { %p2669_p7 = pneg %p2668_p5 }
  0x85   : > { %p2676_p10 = pnand %p2675_p11, %p2669_p7 }
  0x87   : > { %2679 = shalt.err (!%p2676_p10)
}
  0x88   : > { %s3653_s16 = smov 8   ;;  %322 = sbr.rel (%p2967_p4) target bundleno = 1057 (0x421), region = 44 }
  0x89   : > { %2239 = dma.hbm_to_vmem [thread:$0]  (!%p3137_p3), %s309_s17, 2048, %s311_s26, %s3044_s25, %s3642_s24, %s3642_s24, %s3653_s16  }
  0x8a   : > { %s324_s30 = sand.u32 (!%p2967_p4), 1, %s2812_s28  }
  0x8b   : > { %s1981_s13 = sshll.u32 (!%p2967_p4), %s324_s30, 7  ;;  %s325_s3 = scalar_lea.sflag (!%p2967_p4), [#allocation4], %s324_s30 }
  0x8c   : > { %s3152_s0 = scalar_lea.vmem (!%p2967_p4), [#allocation3], %s1981_s13 }
  0x8d   : > { %2763 = dma.done.wait (%p3080_p13), %s325_s3, 2048  }
  0x8e   : > { %2765 = vsyncadd (%p3080_p13), %s325_s3, 4294965248  ;;  %s3655_s12 = sld [smem:[#allocation18_spill]]  ;;  %s333_s14 = sand.u32 1, %s2961_s11  }
  0x8f   : > { %s334_s17 = scalar_lea.sflag [#allocation7], %s333_s14 }
  0x94   : > { %s335_s25 = sand.u32 1, %s3655_s12  }
  0x95   : > { %s2206_s24 = smul.u32 384, %s335_s25 }
  0x97   : > { %s3160_s26 = scalar_lea.vmem [#allocation6], %s2206_s24 }
  0x98   : > { %2767 = dma.done.wait (%p3020_p0), %s334_s17, 6144  }
  0x99   : > { %2769 = vsyncadd (%p3020_p0), %s334_s17, 4294961152  ;;  %s344_s16 = sand.u32 1, %s2788_s22   ;;  %p3657_p4 = scmp.ne.s32.totalorder %s3647_s27, 0 }
  0x9a   : > { %s1982_s15 = sshll.u32 %s344_s16, 7 }
  0x9b   : > { %s3169_s7 = scalar_lea.vmem [#allocation8], %s1982_s15 }
  0x9c   : > { %2771 = dma.done.wait (%p3657_p4), %s334_s17, 2048  }
  0x9d   : > { %2773 = vsyncadd (%p3657_p4), %s334_s17, 4294965248  ;;  %p3658_p13 = scmp.eq.s32.totalorder %s2961_s11, 0 }
  0x9f   : > { %2775 = dma.done.wait (%p3658_p13), [#allocation10], 6144   ;;  %p3659_p12 = pmov %p3658_p13 }
  0xa0   : > { %s3179_s30 = scalar_lea.vmem [#allocation12], %s1982_s15  ;;  %s3660_s13 = sld [smem:[#allocation20_spill]] }
  0xa1   : > { %2777 = vsyncadd (%p3659_p12), [#allocation10], 4294961152 }
  0xa6   : > { %p1986_p0 = scmp.ne.s32.totalorder %s3660_s13, 0 }
  0xa8   : > { %400 = sbr.rel (%p1986_p0) target bundleno = 198 (0xc6), region = 68 }
  0xad   : > { %v2849_v0 = vmov 0.0  }
  0xae   : > { %401 = vst [vmem:[#allocation2 + $0xb0] sm:$0xff] %v2849_v0  ;;  %402 = vst [vmem:[#allocation2 + $0xd0] sm:$0xff] %v2849_v0 }
  0xaf   : > { %403 = vst [vmem:[#allocation2 + $0x10] sm:$0xff] %v2849_v0  ;;  %404 = vst [vmem:[#allocation2 + $0x48] sm:$0xff] %v2849_v0 }
  0xb0   : > { %405 = vst [vmem:[#allocation2 + $0x160] sm:$0xff] %v2849_v0  ;;  %406 = vst [vmem:[#allocation2 + $0x128] sm:$0xff] %v2849_v0 }
  0xb1   : > { %407 = vst [vmem:[#allocation2 + $0x40] sm:$0xff] %v2849_v0  ;;  %408 = vst [vmem:[#allocation2 + $0x178] sm:$0xff] %v2849_v0 }
  0xb2   : > { %409 = vst [vmem:[#allocation2 + $0x108] sm:$0xff] %v2849_v0  ;;  %410 = vst [vmem:[#allocation2 + $0x110] sm:$0xff] %v2849_v0 }
  0xb3   : > { %411 = vst [vmem:[#allocation2 + $0x90] sm:$0xff] %v2849_v0  ;;  %412 = vst [vmem:[#allocation2 + $0x118] sm:$0xff] %v2849_v0 }
  0xb4   : > { %413 = vst [vmem:[#allocation2 + $0x148] sm:$0xff] %v2849_v0  ;;  %414 = vst [vmem:[#allocation2 + $0x100] sm:$0xff] %v2849_v0 }
  0xb5   : > { %415 = vst [vmem:[#allocation2 + $0x58] sm:$0xff] %v2849_v0  ;;  %416 = vst [vmem:[#allocation2 + $0xd8] sm:$0xff] %v2849_v0 }
  0xb6   : > { %417 = vst [vmem:[#allocation2 + $0x80] sm:$0xff] %v2849_v0  ;;  %418 = vst [vmem:[#allocation2 + $0x130] sm:$0xff] %v2849_v0 }
  0xb7   : > { %419 = vst [vmem:[#allocation2 + $0x138] sm:$0xff] %v2849_v0  ;;  %420 = vst [vmem:[#allocation2 + $0x120] sm:$0xff] %v2849_v0 }
  0xb8   : > { %421 = vst [vmem:[#allocation2 + $0xe0] sm:$0xff] %v2849_v0  ;;  %422 = vst [vmem:[#allocation2 + $0xa8] sm:$0xff] %v2849_v0 }
  0xb9   : > { %423 = vst [vmem:[#allocation2 + $0xb8] sm:$0xff] %v2849_v0  ;;  %424 = vst [vmem:[#allocation2 + $0x168] sm:$0xff] %v2849_v0 }
  0xba   : > { %425 = vst [vmem:[#allocation2 + $0xe8] sm:$0xff] %v2849_v0  ;;  %426 = vst [vmem:[#allocation2 + $0xf8] sm:$0xff] %v2849_v0 }
  0xbb   : > { %427 = vst [vmem:[#allocation2 + $0x20] sm:$0xff] %v2849_v0  ;;  %428 = vst [vmem:[#allocation2 + $0x88] sm:$0xff] %v2849_v0 }
  0xbc   : > { %429 = vst [vmem:[#allocation2 + $0xa0] sm:$0xff] %v2849_v0  ;;  %430 = vst [vmem:[#allocation2 + $0x170] sm:$0xff] %v2849_v0 }
  0xbd   : > { %431 = vst [vmem:[#allocation2 + $0xf0] sm:$0xff] %v2849_v0  ;;  %432 = vst [vmem:[#allocation2 + $0x140] sm:$0xff] %v2849_v0 }
  0xbe   : > { %433 = vst [vmem:[#allocation2 + $0x60] sm:$0xff] %v2849_v0  ;;  %434 = vst [vmem:[#allocation2 + $0xc8] sm:$0xff] %v2849_v0 }
  0xbf   : > { %435 = vst [vmem:[#allocation2 + $0x28] sm:$0xff] %v2849_v0  ;;  %436 = vst [vmem:[#allocation2 + $0x38] sm:$0xff] %v2849_v0 }
  0xc0   : > { %437 = vst [vmem:[#allocation2 + $0xc0] sm:$0xff] %v2849_v0  ;;  %438 = vst [vmem:[#allocation2 + $0x18] sm:$0xff] %v2849_v0 }
  0xc1   : > { %439 = vst [vmem:[#allocation2 + $0x98] sm:$0xff] %v2849_v0  ;;  %440 = vst [vmem:[#allocation2 + $0x8] sm:$0xff] %v2849_v0 }
  0xc2   : > { %441 = vst [vmem:[#allocation2] sm:$0xff] %v2849_v0  ;;  %442 = vst [vmem:[#allocation2 + $0x78] sm:$0xff] %v2849_v0 }
  0xc3   : > { %443 = vst [vmem:[#allocation2 + $0x50] sm:$0xff] %v2849_v0  ;;  %444 = vst [vmem:[#allocation2 + $0x68] sm:$0xff] %v2849_v0 }
  0xc4   : > { %445 = vst [vmem:[#allocation2 + $0x70] sm:$0xff] %v2849_v0  ;;  %446 = vst [vmem:[#allocation2 + $0x30] sm:$0xff] %v2849_v0 }
  0xc5   : > { %447 = vst [vmem:[#allocation2 + $0x158] sm:$0xff] %v2849_v0  ;;  %448 = vst [vmem:[#allocation2 + $0x150] sm:$0xff] %v2849_v0 }
  0xc6 PF: > { %v559_v1 = vld [vmem:[%s3160_s26 + $0x170] sm:$0xff]  ;;  %v558_v2 = vld [vmem:[%s3160_s26 + $0x168] sm:$0xff]  ;;  %v556_v3 = vld [vmem:[%s3160_s26 + $0x158] sm:$0xff]  ;;  %v2850_v5 = vmov 0.0   ;;  %s3661_s11 = sld [smem:[#allocation20_spill]] }
  0xc7   : > { %561 = vmatprep.subr.mxu0 %v559_v1  ;;  %v555_v4 = vld [vmem:[%s3160_s26 + $0x150] sm:$0xff]  ;;  %625 = vmatprep.mubr.f32.mxu0 %v2850_v5  ;;  %v553_v6 = vld [vmem:[%s3160_s26 + $0x140] sm:$0xff]  ;;  %v552_v7 = vld [vmem:[%s3160_s26 + $0x138] sm:$0xff] }
  0xc8   : > { %562 = vmatpush1.msra.mxu0 %v558_v2  ;;  %v550_v8 = vld [vmem:[%s3160_s26 + $0x128] sm:$0xff]  ;;  %v549_v9 = vld [vmem:[%s3160_s26 + $0x120] sm:$0xff]  ;;  %v547_v10 = vld [vmem:[%s3160_s26 + $0x110] sm:$0xff] }
  0xc9   : > { %563 = vmatprep.subr.mxu0 %v556_v3  ;;  %v546_v11 = vld [vmem:[%s3160_s26 + $0x108] sm:$0xff]  ;;  %v544_v12 = vld [vmem:[%s3160_s26 + $0xf8] sm:$0xff]  ;;  %v543_v13 = vld [vmem:[%s3160_s26 + $0xf0] sm:$0xff] }
  0xca   : > { %564 = vmatpush1.msra.mxu0 %v555_v4  ;;  %v541_v14 = vld [vmem:[%s3160_s26 + $0xe0] sm:$0xff]  ;;  %v560_v15 = vld [vmem:[%s3160_s26 + $0x178] sm:$0xff]  ;;  %v538_v18 = vld [vmem:[%s3160_s26 + $0xc8] sm:$0xff] }
  0xcb   : > { %565 = vmatprep.subr.mxu0 %v553_v6  ;;  %v540_v16 = vld [vmem:[%s3160_s26 + $0xd8] sm:$0xff]  ;;  %2091 = vmatprep.subr.mxu1 %v560_v15  ;;  %v557_v17 = vld [vmem:[%s3160_s26 + $0x160] sm:$0xff]  ;;  %v554_v19 = vld [vmem:[%s3160_s26 + $0x148] sm:$0xff] }
  0xcc   : > { %566 = vmatpush1.msra.mxu0 %v552_v7  ;;  %2092 = vmatpush3.msra.mxu1 %v560_v15  ;;  %v537_v20 = vld [vmem:[%s3160_s26 + $0xc0] sm:$0xff]  ;;  %v535_v21 = vld [vmem:[%s3160_s26 + $0xb0] sm:$0xff]  ;;  %v534_v23 = vld [vmem:[%s3160_s26 + $0xa8] sm:$0xff]  ;;  %p1987_p10 = scmp.ne.s32.totalorder %s3661_s11, 2 }
  0xcd   : > { %567 = vmatprep.subr.mxu0 %v550_v8  ;;  %2093 = vmatprep.subr.mxu1 %v557_v17  ;;  %v551_v22 = vld [vmem:[%s3160_s26 + $0x130] sm:$0xff]  ;;  %v532_v24 = vld [vmem:[%s3160_s26 + $0x98] sm:$0xff]  ;;  %v529_v27 = vld [vmem:[%s3160_s26 + $0x80] sm:$0xff] }
  0xce   : > { %568 = vmatpush1.msra.mxu0 %v549_v9  ;;  %2094 = vmatpush3.msra.mxu1 %v557_v17  ;;  %v548_v25 = vld [vmem:[%s3160_s26 + $0x118] sm:$0xff]  ;;  %v531_v26 = vld [vmem:[%s3160_s26 + $0x90] sm:$0xff]  ;;  %v545_v28 = vld [vmem:[%s3160_s26 + $0x100] sm:$0xff] }
  0xcf   : > { %569 = vmatprep.subr.mxu0 %v547_v10  ;;  %2095 = vmatprep.subr.mxu1 %v554_v19  ;;  %v528_v29 = vld [vmem:[%s3160_s26 + $0x78] sm:$0xff]  ;;  %v526_v30 = vld [vmem:[%s3160_s26 + $0x68] sm:$0xff]  ;;  %v525_v32 = vld [vmem:[%s3160_s26 + $0x60] sm:$0xff] }
  0xd0   : > { %570 = vmatpush1.msra.mxu0 %v546_v11  ;;  %2096 = vmatpush3.msra.mxu1 %v554_v19  ;;  %v542_v31 = vld [vmem:[%s3160_s26 + $0xe8] sm:$0xff]  ;;  %v523_v33 = vld [vmem:[%s3160_s26 + $0x50] sm:$0xff]  ;;  %v520_v36 = vld [vmem:[%s3160_s26 + $0x38] sm:$0xff] }
  0xd1   : > { %571 = vmatprep.subr.mxu0 %v544_v12  ;;  %2097 = vmatprep.subr.mxu1 %v551_v22  ;;  %v539_v34 = vld [vmem:[%s3160_s26 + $0xd0] sm:$0xff]  ;;  %v522_v35 = vld [vmem:[%s3160_s26 + $0x48] sm:$0xff]  ;;  %v536_v37 = vld [vmem:[%s3160_s26 + $0xb8] sm:$0xff] }
  0xd2   : > { %572 = vmatpush1.msra.mxu0 %v543_v13  ;;  %2098 = vmatpush3.msra.mxu1 %v551_v22  ;;  %v519_v38 = vld [vmem:[%s3160_s26 + $0x30] sm:$0xff]  ;;  %v517_v39 = vld [vmem:[%s3160_s26 + $0x20] sm:$0xff]  ;;  %v516_v41 = vld [vmem:[%s3160_s26 + $0x18] sm:$0xff] }
  0xd3   : > { %573 = vmatprep.subr.mxu0 %v541_v14  ;;  %2099 = vmatprep.subr.mxu1 %v548_v25  ;;  %v533_v40 = vld [vmem:[%s3160_s26 + $0xa0] sm:$0xff]  ;;  %v514_v42 = vld [vmem:[%s3160_s26 + $0x8] sm:$0xff]  ;;  %v527_v46 = vld [vmem:[%s3160_s26 + $0x70] sm:$0xff] }
  0xd4   : > { %574 = vmatpush1.msra.mxu0 %v540_v16  ;;  %2100 = vmatpush3.msra.mxu1 %v548_v25  ;;  %v530_v43 = vld [vmem:[%s3160_s26 + $0x88] sm:$0xff]  ;;  %v513_v44 = vld [vmem:[%s3160_s26] sm:$0xff]  ;;  %v524_v47 = vld [vmem:[%s3160_s26 + $0x58] sm:$0xff] }
  0xd5   : > { %575 = vmatprep.subr.mxu0 %v538_v18  ;;  %2101 = vmatprep.subr.mxu1 %v545_v28  ;;  %v497_v45 = vld [vmem:[%s3152_s0] sm:$0xff]  ;;  %v498_v48 = vld [vmem:[%s3152_s0 + $0x8] sm:$0xff]  ;;  %v499_v51 = vld [vmem:[%s3152_s0 + $0x10] sm:$0xff] }
  0xd6   : > { %576 = vmatpush1.msra.mxu0 %v537_v20  ;;  %2102 = vmatpush3.msra.mxu1 %v545_v28  ;;  %v521_v49 = vld [vmem:[%s3160_s26 + $0x40] sm:$0xff]  ;;  %v518_v50 = vld [vmem:[%s3160_s26 + $0x28] sm:$0xff]  ;;  %v515_v52 = vld [vmem:[%s3160_s26 + $0x10] sm:$0xff] }
  0xd7   : > { %577 = vmatprep.subr.mxu0 %v535_v21  ;;  %2103 = vmatprep.subr.mxu1 %v542_v31  ;;  %v500_v53 = vld [vmem:[%s3152_s0 + $0x18] sm:$0xff]  ;;  %v501_v54 = vld [vmem:[%s3152_s0 + $0x20] sm:$0xff]  ;;  %v502_v55 = vld [vmem:[%s3152_s0 + $0x28] sm:$0xff] }
  0xd8   : > { %578 = vmatpush1.msra.mxu0 %v534_v23  ;;  %2104 = vmatpush3.msra.mxu1 %v542_v31  ;;  %v503_v56 = vld [vmem:[%s3152_s0 + $0x30] sm:$0xff]  ;;  %v504_v57 = vld [vmem:[%s3152_s0 + $0x38] sm:$0xff]  ;;  %v505_v58 = vld [vmem:[%s3152_s0 + $0x40] sm:$0xff] }
  0xd9   : > { %579 = vmatprep.subr.mxu0 %v532_v24  ;;  %2105 = vmatprep.subr.mxu1 %v539_v34  ;;  %v506_v59 = vld [vmem:[%s3152_s0 + $0x48] sm:$0xff]  ;;  %v507_v60 = vld [vmem:[%s3152_s0 + $0x50] sm:$0xff]  ;;  %v508_v61 = vld [vmem:[%s3152_s0 + $0x58] sm:$0xff] }
  0xda   : > { %580 = vmatpush1.msra.mxu0 %v531_v26  ;;  %2106 = vmatpush3.msra.mxu1 %v539_v34  ;;  %v509_v62 = vld [vmem:[%s3152_s0 + $0x60] sm:$0xff]  ;;  %v511_v63 = vld [vmem:[%s3152_s0 + $0x70] sm:$0xff]  ;;  %v510_v0 = vld [vmem:[%s3152_s0 + $0x68] sm:$0xff] }
  0xdb   : > { %581 = vmatprep.subr.mxu0 %v529_v27  ;;  %2107 = vmatprep.subr.mxu1 %v536_v37  ;;  %v512_v1 = vld [vmem:[%s3152_s0 + $0x78] sm:$0xff]  ;;  %v449_v2 = vld [vmem:[#allocation2 + $0xb0] sm:$0xff]  ;;  %v452_v8 = vld [vmem:[#allocation2 + $0x48] sm:$0xff]  ;;  %s3662_s0 = sld [smem:[#allocation29_spill]] (!%p1987_p10) }
  0xdc   : > { %582 = vmatpush1.msra.mxu0 %v528_v29  ;;  %2108 = vmatpush3.msra.mxu1 %v536_v37  ;;  %v450_v4 = vld [vmem:[#allocation2 + $0xd0] sm:$0xff]  ;;  %v453_v11 = vld [vmem:[#allocation2 + $0x160] sm:$0xff]  ;;  %v456_v17 = vld [vmem:[#allocation2 + $0x178] sm:$0xff] }
  0xdd   : > { %583 = vmatprep.subr.mxu0 %v526_v30  ;;  %2109 = vmatprep.subr.mxu1 %v533_v40  ;;  %v455_v14 = vld [vmem:[#allocation2 + $0x40] sm:$0xff]  ;;  %v458_v20 = vld [vmem:[#allocation2 + $0x110] sm:$0xff]  ;;  %v460_v28 = vld [vmem:[#allocation2 + $0x118] sm:$0xff] }
  0xde   : > { %584 = vmatpush1.msra.mxu0 %v525_v32  ;;  %2110 = vmatpush3.msra.mxu1 %v533_v40  ;;  %v451_v22 = vld [vmem:[#allocation2 + $0x10] sm:$0xff]  ;;  %v461_v32 = vld [vmem:[#allocation2 + $0x148] sm:$0xff] }
  0xdf   : > { %585 = vmatprep.subr.mxu0 %v523_v33  ;;  %2111 = vmatprep.subr.mxu1 %v530_v43  ;;  %v459_v26 = vld [vmem:[#allocation2 + $0x90] sm:$0xff]  ;;  %v457_v34 = vld [vmem:[#allocation2 + $0x108] sm:$0xff] }
  0xe0   : > { %586 = vmatpush1.msra.mxu0 %v522_v35  ;;  %2112 = vmatpush3.msra.mxu1 %v530_v43  ;;  %v466_v40 = vld [vmem:[#allocation2 + $0x130] sm:$0xff] }
  0xe1   : > { %587 = vmatprep.subr.mxu0 %v520_v36  ;;  %2113 = vmatprep.subr.mxu1 %v527_v46 }
  0xe2   : > { %588 = vmatpush1.msra.mxu0 %v519_v38  ;;  %2114 = vmatpush3.msra.mxu1 %v527_v46  ;;  %v462_v38 = vld [vmem:[#allocation2 + $0x100] sm:$0xff]  ;;  %v463_v46 = vld [vmem:[#allocation2 + $0x58] sm:$0xff] }
  0xe3   : > { %589 = vmatprep.subr.mxu0 %v517_v39  ;;  %2115 = vmatprep.subr.mxu1 %v524_v47 }
  0xe4   : > { %590 = vmatpush1.msra.mxu0 %v516_v41  ;;  %2123 = vmatprep.mubr.f32.mxu1 %v497_v45 }
  0xe5   : > { %591 = vmatprep.subr.mxu0 %v514_v42  ;;  %2116 = vmatpush3.msra.mxu1 %v524_v47 }
  0xe6   : > { %592 = vmatpush1.msra.mxu0 %v513_v44  ;;  %2117 = vmatprep.subr.mxu1 %v521_v49  ;;  %v464_v44 = vld [vmem:[#allocation2 + $0xd8] sm:$0xff] }
  0xe7   : > { %626 = vmatmul.mubr.f32.vlgmr.msra.gmra.mxu0 %v497_v45  ;;  %2118 = vmatpush3.msra.mxu1 %v521_v49 }
  0xe8   : > { %631 = vmatprep.mubr.f32.mxu0 %v2850_v5  ;;  %2119 = vmatprep.subr.mxu1 %v518_v50 }
  0xe9   : > { %2120 = vmatpush3.msra.mxu1 %v518_v50  ;;  %v465_v50 = vld [vmem:[#allocation2 + $0x80] sm:$0xff] }
  0xea   : > { %2121 = vmatprep.subr.mxu1 %v515_v52 }
  0xeb   : > { %632 = vmatmul.mubr.f32.gmra.mxu0 %v498_v48  ;;  %2122 = vmatpush3.msra.mxu1 %v515_v52  ;;  %v472_v52 = vld [vmem:[#allocation2 + $0x168] sm:$0xff] }
  0xec   : > { %637 = vmatprep.mubr.f32.mxu0 %v2850_v5  ;;  %2124 = vmatmul.mubr.f32.vlgmr.msra.gmra.mxu1 %v498_v48 }
  0xed   : > { %2126 = vmatprep.mubr.f32.mxu1 %v499_v51 }
  0xef   : > { %638 = vmatmul.mubr.f32.gmra.mxu0 %v499_v51 }
  0xf0   : > { %643 = vmatprep.mubr.f32.mxu0 %v2850_v5  ;;  %2127 = vmatmul.mubr.f32.gmra.mxu1 %v500_v53 }
  0xf1   : > { %2129 = vmatprep.mubr.f32.mxu1 %v501_v54 }
  0xf3   : > { %644 = vmatmul.mubr.f32.gmra.mxu0 %v500_v53 }
  0xf4   : > { %649 = vmatprep.mubr.f32.mxu0 %v2850_v5  ;;  %2130 = vmatmul.mubr.f32.gmra.mxu1 %v502_v55 }
  0xf5   : > { %2132 = vmatprep.mubr.f32.mxu1 %v503_v56 }
  0xf7   : > { %650 = vmatmul.mubr.f32.gmra.mxu0 %v501_v54 }
  0xf8   : > { %655 = vmatprep.mubr.f32.mxu0 %v2850_v5  ;;  %2133 = vmatmul.mubr.f32.gmra.mxu1 %v504_v57 }
  0xf9   : > { %2135 = vmatprep.mubr.f32.mxu1 %v505_v58 }
  0xfb   : > { %656 = vmatmul.mubr.f32.gmra.mxu0 %v502_v55 }
  0xfc   : > { %661 = vmatprep.mubr.f32.mxu0 %v2850_v5  ;;  %2136 = vmatmul.mubr.f32.gmra.mxu1 %v506_v59 }
  0xfd   : > { %2138 = vmatprep.mubr.f32.mxu1 %v507_v60 }
  0xff   : > { %662 = vmatmul.mubr.f32.gmra.mxu0 %v503_v56  ;;  %v467_v56 = vld [vmem:[#allocation2 + $0x138] sm:$0xff] }
 0x100   : > { %667 = vmatprep.mubr.f32.mxu0 %v2850_v5  ;;  %2139 = vmatmul.mubr.f32.gmra.mxu1 %v508_v61 }
 0x101   : > { %2141 = vmatprep.mubr.f32.mxu1 %v509_v62 }
 0x103   : > { %668 = vmatmul.mubr.f32.gmra.mxu0 %v504_v57 }
 0x104   : > { %673 = vmatprep.mubr.f32.mxu0 %v2850_v5  ;;  %2142 = vmatmul.mubr.f32.gmra.mxu1 %v510_v0 }
 0x105   : > { %2144 = vmatprep.mubr.f32.mxu1 %v511_v63 }
 0x107   : > { %674 = vmatmul.mubr.f32.gmra.mxu0 %v505_v58  ;;  %v469_v58 = vld [vmem:[#allocation2 + $0xe0] sm:$0xff] }
 0x108   : > { %679 = vmatprep.mubr.f32.mxu0 %v2850_v5  ;;  %2145 = vmatmul.mubr.f32.gmra.mxu1 %v512_v1 }
 0x10b   : > { %680 = vmatmul.mubr.f32.gmra.mxu0 %v506_v59 }
 0x10c   : > { %685 = vmatprep.mubr.f32.mxu0 %v2850_v5 }
 0x10f   : > { %686 = vmatmul.mubr.f32.gmra.mxu0 %v507_v60 }
 0x110   : > { %691 = vmatprep.mubr.f32.mxu0 %v2850_v5 }
 0x113   : > { %692 = vmatmul.mubr.f32.gmra.mxu0 %v508_v61 }
 0x114   : > { %697 = vmatprep.mubr.f32.mxu0 %v2850_v5 }
 0x117   : > { %698 = vmatmul.mubr.f32.gmra.mxu0 %v509_v62  ;;  %v468_v62 = vld [vmem:[#allocation2 + $0x120] sm:$0xff] }
 0x118   : > { %703 = vmatprep.mubr.f32.mxu0 %v2850_v5 }
 0x11b   : > { %704 = vmatmul.mubr.f32.gmra.mxu0 %v510_v0  ;;  %v478_v0 = vld [vmem:[#allocation2 + $0x170] sm:$0xff] }
 0x11c   : > { %709 = vmatprep.mubr.f32.mxu0 %v2850_v5 }
 0x11f   : > { %710 = vmatmul.mubr.f32.gmra.mxu0 %v511_v63 }
 0x120   : > { %715 = vmatprep.mubr.f32.mxu0 %v2850_v5  ;;  %v454_v5 = vld [vmem:[#allocation2 + $0x128] sm:$0xff] }
 0x123   : > { %716 = vmatmul.mubr.f32.gmra.mxu0 %v512_v1 }
 0x1a7   : > { %v627_v3 = vpop.f32.mrf.mxu0 }
 0x1a8   : > { %v867_v6 = vadd.f32 %v627_v3, %v449_v2 }
 0x1a9   : > { %v629_v7 = vpop.f32.mrf.mxu0 }
 0x1aa   : > { %915 = vst [vmem:[#allocation2 + $0xb0] sm:$0xff] %v867_v6  ;;  %v868_v9 = vadd.f32 %v629_v7, %v450_v4  ;;  %v470_v4 = vld [vmem:[#allocation2 + $0xa8] sm:$0xff]  ;;  %v475_v7 = vld [vmem:[#allocation2 + $0x20] sm:$0xff] }
 0x1ab   : > { %v633_v10 = vpop.f32.mrf.mxu0 }
 0x1ac   : > { %916 = vst [vmem:[#allocation2 + $0xd0] sm:$0xff] %v868_v9  ;;  %v870_v12 = vadd.f32 %v633_v10, %v452_v8  ;;  %v2125_v21 = vpop.f32.mrf.mxu1 }
 0x1ad   : > { %v635_v13 = vpop.f32.mrf.mxu0  ;;  %v872_v24 = vadd.f32 %v2125_v21, %v454_v5 }
 0x1ae   : > { %918 = vst [vmem:[#allocation2 + $0x48] sm:$0xff] %v870_v12  ;;  %v871_v15 = vadd.f32 %v635_v13, %v453_v11  ;;  %v788_v27 = vpop.f32.mrf.mxu1  ;;  %v471_v11 = vld [vmem:[#allocation2 + $0xb8] sm:$0xff] }
 0x1af   : > { %v639_v16 = vpop.f32.mrf.mxu0  ;;  %920 = vst [vmem:[#allocation2 + $0x128] sm:$0xff] %v872_v24  ;;  %v869_v30 = vadd.f32 %v788_v27, %v451_v22  ;;  %v484_v13 = vld [vmem:[#allocation2 + $0x38] sm:$0xff] }
 0x1b0   : > { %919 = vst [vmem:[#allocation2 + $0x160] sm:$0xff] %v871_v15  ;;  %v873_v18 = vadd.f32 %v639_v16, %v455_v14  ;;  %v2128_v33 = vpop.f32.mrf.mxu1  ;;  %v474_v22 = vld [vmem:[#allocation2 + $0xf8] sm:$0xff] }
 0x1b1   : > { %v641_v19 = vpop.f32.mrf.mxu0  ;;  %917 = vst [vmem:[#allocation2 + $0x10] sm:$0xff] %v869_v30  ;;  %v878_v36 = vadd.f32 %v2128_v33, %v460_v28  ;;  %v490_v24 = vld [vmem:[#allocation2 + $0x78] sm:$0xff]  ;;  %v476_v28 = vld [vmem:[#allocation2 + $0x88] sm:$0xff] }
 0x1b2   : > { %921 = vst [vmem:[#allocation2 + $0x40] sm:$0xff] %v873_v18  ;;  %v874_v23 = vadd.f32 %v641_v19, %v456_v17  ;;  %v798_v39 = vpop.f32.mrf.mxu1  ;;  %v473_v17 = vld [vmem:[#allocation2 + $0xe8] sm:$0xff]  ;;  %v481_v18 = vld [vmem:[#allocation2 + $0x60] sm:$0xff]  ;;  %v487_v30 = vld [vmem:[#allocation2 + $0x98] sm:$0xff] }
 0x1b3   : > { %v645_v25 = vpop.f32.mrf.mxu0  ;;  %926 = vst [vmem:[#allocation2 + $0x118] sm:$0xff] %v878_v36  ;;  %v875_v42 = vadd.f32 %v798_v39, %v457_v34  ;;  %v477_v34 = vld [vmem:[#allocation2 + $0xa0] sm:$0xff]  ;;  %v496_v36 = vld [vmem:[#allocation2 + $0x150] sm:$0xff] }
 0x1b4   : > { %922 = vst [vmem:[#allocation2 + $0x178] sm:$0xff] %v874_v23  ;;  %v876_v29 = vadd.f32 %v645_v25, %v458_v20  ;;  %v2131_v45 = vpop.f32.mrf.mxu1 }
 0x1b5   : > { %v647_v31 = vpop.f32.mrf.mxu0  ;;  %923 = vst [vmem:[#allocation2 + $0x108] sm:$0xff] %v875_v42  ;;  %v884_v48 = vadd.f32 %v2131_v45, %v466_v40  ;;  %v479_v40 = vld [vmem:[#allocation2 + $0xf0] sm:$0xff] }
 0x1b6   : > { %924 = vst [vmem:[#allocation2 + $0x110] sm:$0xff] %v876_v29  ;;  %v877_v35 = vadd.f32 %v647_v31, %v459_v26  ;;  %v808_v51 = vpop.f32.mrf.mxu1  ;;  %v493_v42 = vld [vmem:[#allocation2 + $0x70] sm:$0xff] }
 0x1b7   : > { %v651_v37 = vpop.f32.mrf.mxu0  ;;  %932 = vst [vmem:[#allocation2 + $0x130] sm:$0xff] %v884_v48  ;;  %v881_v54 = vadd.f32 %v808_v51, %v463_v46  ;;  %v480_v46 = vld [vmem:[#allocation2 + $0x140] sm:$0xff]  ;;  %v482_v51 = vld [vmem:[#allocation2 + $0xc8] sm:$0xff] }
 0x1b8   : > { %925 = vst [vmem:[#allocation2 + $0x90] sm:$0xff] %v877_v35  ;;  %v879_v41 = vadd.f32 %v651_v37, %v461_v32  ;;  %v2134_v57 = vpop.f32.mrf.mxu1 }
 0x1b9   : > { %v653_v43 = vpop.f32.mrf.mxu0  ;;  %929 = vst [vmem:[#allocation2 + $0x58] sm:$0xff] %v881_v54  ;;  %v890_v60 = vadd.f32 %v2134_v57, %v472_v52  ;;  %v483_v54 = vld [vmem:[#allocation2 + $0x28] sm:$0xff]  ;;  %v485_v57 = vld [vmem:[#allocation2 + $0xc0] sm:$0xff] }
 0x1ba   : > { %927 = vst [vmem:[#allocation2 + $0x148] sm:$0xff] %v879_v41  ;;  %v880_v47 = vadd.f32 %v653_v43, %v462_v38  ;;  %v818_v63 = vpop.f32.mrf.mxu1 }
 0x1bb   : > { %v657_v49 = vpop.f32.mrf.mxu0  ;;  %938 = vst [vmem:[#allocation2 + $0x168] sm:$0xff] %v890_v60  ;;  %v887_v2 = vadd.f32 %v818_v63, %v469_v58  ;;  %v486_v60 = vld [vmem:[#allocation2 + $0x18] sm:$0xff]  ;;  %v488_v63 = vld [vmem:[#allocation2 + $0x8] sm:$0xff] }
 0x1bc   : > { %928 = vst [vmem:[#allocation2 + $0x100] sm:$0xff] %v880_v47  ;;  %v882_v53 = vadd.f32 %v657_v49, %v464_v44  ;;  %v2137_v6 = vpop.f32.mrf.mxu1 }
 0x1bd   : > { %v659_v55 = vpop.f32.mrf.mxu0  ;;  %935 = vst [vmem:[#allocation2 + $0xe0] sm:$0xff] %v887_v2  ;;  %v896_v9 = vadd.f32 %v2137_v6, %v478_v0  ;;  %v489_v2 = vld [vmem:[#allocation2] sm:$0xff]  ;;  %v491_v6 = vld [vmem:[#allocation2 + $0x50] sm:$0xff] }
 0x1be   : > { %930 = vst [vmem:[#allocation2 + $0xd8] sm:$0xff] %v882_v53  ;;  %v883_v59 = vadd.f32 %v659_v55, %v465_v50  ;;  %v828_v12 = vpop.f32.mrf.mxu1 }
 0x1bf   : > { %v663_v61 = vpop.f32.mrf.mxu0  ;;  %944 = vst [vmem:[#allocation2 + $0x170] sm:$0xff] %v896_v9  ;;  %v893_v15 = vadd.f32 %v828_v12, %v475_v7  ;;  %v492_v9 = vld [vmem:[#allocation2 + $0x68] sm:$0xff]  ;;  %v494_v12 = vld [vmem:[#allocation2 + $0x30] sm:$0xff] }
 0x1c0   : > { %931 = vst [vmem:[#allocation2 + $0x80] sm:$0xff] %v883_v59  ;;  %v885_v1 = vadd.f32 %v663_v61, %v467_v56  ;;  %v2140_v5 = vpop.f32.mrf.mxu1 }
 0x1c1   : > { %v665_v3 = vpop.f32.mrf.mxu0  ;;  %941 = vst [vmem:[#allocation2 + $0x20] sm:$0xff] %v893_v15  ;;  %v902_v20 = vadd.f32 %v2140_v5, %v484_v13  ;;  %v495_v15 = vld [vmem:[#allocation2 + $0x158] sm:$0xff] }
 0x1c2   : > { %933 = vst [vmem:[#allocation2 + $0x138] sm:$0xff] %v885_v1  ;;  %v886_v8 = vadd.f32 %v665_v3, %v468_v62  ;;  %v838_v23 = vpop.f32.mrf.mxu1 }
 0x1c3   : > { %v669_v10 = vpop.f32.mrf.mxu0  ;;  %950 = vst [vmem:[#allocation2 + $0x38] sm:$0xff] %v902_v20  ;;  %v899_v26 = vadd.f32 %v838_v23, %v481_v18 }
 0x1c4   : > { %934 = vst [vmem:[#allocation2 + $0x120] sm:$0xff] %v886_v8  ;;  %v888_v14 = vadd.f32 %v669_v10, %v470_v4  ;;  %v2143_v29 = vpop.f32.mrf.mxu1 }
 0x1c5   : > { %v671_v16 = vpop.f32.mrf.mxu0  ;;  %947 = vst [vmem:[#allocation2 + $0x60] sm:$0xff] %v899_v26  ;;  %v908_v32 = vadd.f32 %v2143_v29, %v490_v24 }
 0x1c6   : > { %936 = vst [vmem:[#allocation2 + $0xa8] sm:$0xff] %v888_v14  ;;  %v889_v19 = vadd.f32 %v671_v16, %v471_v11  ;;  %v848_v35 = vpop.f32.mrf.mxu1 }
 0x1c7   : > { %v675_v21 = vpop.f32.mrf.mxu0  ;;  %956 = vst [vmem:[#allocation2 + $0x78] sm:$0xff] %v908_v32  ;;  %v905_v38 = vadd.f32 %v848_v35, %v487_v30 }
 0x1c8   : > { %937 = vst [vmem:[#allocation2 + $0xb8] sm:$0xff] %v889_v19  ;;  %v891_v25 = vadd.f32 %v675_v21, %v473_v17  ;;  %v2146_v41 = vpop.f32.mrf.mxu1 }
 0x1c9   : > { %v677_v27 = vpop.f32.mrf.mxu0  ;;  %953 = vst [vmem:[#allocation2 + $0x98] sm:$0xff] %v905_v38  ;;  %v914_v44 = vadd.f32 %v2146_v41, %v496_v36 }
 0x1ca   : > { %939 = vst [vmem:[#allocation2 + $0xe8] sm:$0xff] %v891_v25  ;;  %v892_v31 = vadd.f32 %v677_v27, %v474_v22  ;;  %v858_v47 = vpop.f32.mrf.mxu1 }
 0x1cb   : > { %v681_v33 = vpop.f32.mrf.mxu0  ;;  %962 = vst [vmem:[#allocation2 + $0x150] sm:$0xff] %v914_v44  ;;  %v911_v49 = vadd.f32 %v858_v47, %v493_v42 }
 0x1cc   : > { %940 = vst [vmem:[#allocation2 + $0xf8] sm:$0xff] %v892_v31  ;;  %v894_v37 = vadd.f32 %v681_v33, %v476_v28 }
 0x1cd   : > { %v683_v39 = vpop.f32.mrf.mxu0  ;;  %959 = vst [vmem:[#allocation2 + $0x70] sm:$0xff] %v911_v49 }
 0x1ce   : > { %942 = vst [vmem:[#allocation2 + $0x88] sm:$0xff] %v894_v37  ;;  %v895_v43 = vadd.f32 %v683_v39, %v477_v34 }
 0x1cf   : > { %v687_v45 = vpop.f32.mrf.mxu0 }
 0x1d0   : > { %943 = vst [vmem:[#allocation2 + $0xa0] sm:$0xff] %v895_v43  ;;  %v897_v48 = vadd.f32 %v687_v45, %v479_v40 }
 0x1d1   : > { %v689_v50 = vpop.f32.mrf.mxu0 }
 0x1d2   : > { %945 = vst [vmem:[#allocation2 + $0xf0] sm:$0xff] %v897_v48  ;;  %v898_v52 = vadd.f32 %v689_v50, %v480_v46 }
 0x1d3   : > { %v693_v53 = vpop.f32.mrf.mxu0 }
 0x1d4   : > { %946 = vst [vmem:[#allocation2 + $0x140] sm:$0xff] %v898_v52  ;;  %v900_v55 = vadd.f32 %v693_v53, %v482_v51 }
 0x1d5   : > { %v695_v56 = vpop.f32.mrf.mxu0 }
 0x1d6   : > { %948 = vst [vmem:[#allocation2 + $0xc8] sm:$0xff] %v900_v55  ;;  %v901_v58 = vadd.f32 %v695_v56, %v483_v54 }
 0x1d7   : > { %v699_v59 = vpop.f32.mrf.mxu0 }
 0x1d8   : > { %949 = vst [vmem:[#allocation2 + $0x28] sm:$0xff] %v901_v58  ;;  %v903_v61 = vadd.f32 %v699_v59, %v485_v57 }
 0x1d9   : > { %v701_v62 = vpop.f32.mrf.mxu0 }
 0x1da   : > { %951 = vst [vmem:[#allocation2 + $0xc0] sm:$0xff] %v903_v61  ;;  %v904_v0 = vadd.f32 %v701_v62, %v486_v60 }
 0x1db   : > { %v705_v1 = vpop.f32.mrf.mxu0 }
 0x1dc   : > { %952 = vst [vmem:[#allocation2 + $0x18] sm:$0xff] %v904_v0  ;;  %v906_v3 = vadd.f32 %v705_v1, %v488_v63 }
 0x1dd   : > { %v707_v4 = vpop.f32.mrf.mxu0 }
 0x1de   : > { %954 = vst [vmem:[#allocation2 + $0x8] sm:$0xff] %v906_v3  ;;  %v907_v7 = vadd.f32 %v707_v4, %v489_v2 }
 0x1df   : > { %v711_v8 = vpop.f32.mrf.mxu0 }
 0x1e0   : > { %955 = vst [vmem:[#allocation2] sm:$0xff] %v907_v7  ;;  %v909_v10 = vadd.f32 %v711_v8, %v491_v6 }
 0x1e1   : > { %v713_v11 = vpop.f32.mrf.mxu0 }
 0x1e2   : > { %957 = vst [vmem:[#allocation2 + $0x50] sm:$0xff] %v909_v10  ;;  %v910_v13 = vadd.f32 %v713_v11, %v492_v9 }
 0x1e3   : > { %v717_v14 = vpop.f32.mrf.mxu0 }
 0x1e4   : > { %958 = vst [vmem:[#allocation2 + $0x68] sm:$0xff] %v910_v13  ;;  %v912_v16 = vadd.f32 %v717_v14, %v494_v12  ;;  %966 = sbr.rel (%p1987_p10) target bundleno = 1030 (0x406), region = 72 }
 0x1e5   : > { %v719_v17 = vpop.f32.mrf.mxu0 }
 0x1e6   : > { %960 = vst [vmem:[#allocation2 + $0x30] sm:$0xff] %v912_v16  ;;  %v913_v5 = vadd.f32 %v719_v17, %v495_v15 }
 0x1e8   : > { %961 = vst [vmem:[#allocation2 + $0x158] sm:$0xff] %v913_v5 }
 0x1e9   : > { %v1127_v18 = vld [vmem:[#allocation9 + $0xf8] sm:$0xff]  ;;  %v1126_v19 = vld [vmem:[#allocation9 + $0xf0] sm:$0xff]  ;;  %v1125_v20 = vld [vmem:[#allocation9 + $0xe8] sm:$0xff]  ;;  %v2851_v22 = vmov 0.0  }
 0x1ea   : > { %1128 = vmatprep.subr.mxu0 %v1127_v18  ;;  %v1124_v21 = vld [vmem:[#allocation9 + $0xe0] sm:$0xff]  ;;  %1192 = vmatprep.mubr.f32.mxu0 %v2851_v22  ;;  %v1123_v23 = vld [vmem:[#allocation9 + $0xd8] sm:$0xff]  ;;  %v1122_v24 = vld [vmem:[#allocation9 + $0xd0] sm:$0xff] }
 0x1eb   : > { %1129 = vmatpush1.msra.mxu0 %v1126_v19  ;;  %v1121_v25 = vld [vmem:[#allocation9 + $0xc8] sm:$0xff]  ;;  %v1120_v26 = vld [vmem:[#allocation9 + $0xc0] sm:$0xff]  ;;  %v1119_v27 = vld [vmem:[#allocation9 + $0xb8] sm:$0xff]  ;;  %v1017_v19 = vlaneseq }
 0x1ec   : > { %1130 = vmatprep.subr.mxu0 %v1125_v20  ;;  %v1118_v28 = vld [vmem:[#allocation9 + $0xb0] sm:$0xff]  ;;  %v1117_v29 = vld [vmem:[#allocation9 + $0xa8] sm:$0xff]  ;;  %v1116_v30 = vld [vmem:[#allocation9 + $0xa0] sm:$0xff] }
 0x1ed   : > { %1131 = vmatpush1.msra.mxu0 %v1124_v21  ;;  %v1115_v31 = vld [vmem:[#allocation9 + $0x98] sm:$0xff]  ;;  %v1114_v32 = vld [vmem:[#allocation9 + $0x90] sm:$0xff]  ;;  %v1113_v33 = vld [vmem:[#allocation9 + $0x88] sm:$0xff]  ;;  %v3343_v20 = vshrl.u32 %v1017_v19, 7 }
 0x1ee   : > { %1132 = vmatprep.subr.mxu0 %v1123_v23  ;;  %v1112_v34 = vld [vmem:[#allocation9 + $0x80] sm:$0xff]  ;;  %v1111_v35 = vld [vmem:[#allocation9 + $0x78] sm:$0xff]  ;;  %v1110_v36 = vld [vmem:[#allocation9 + $0x70] sm:$0xff] }
 0x1ef   : > { %1133 = vmatpush1.msra.mxu0 %v1122_v24  ;;  %v1109_v37 = vld [vmem:[#allocation9 + $0x68] sm:$0xff]  ;;  %v1108_v38 = vld [vmem:[#allocation9 + $0x60] sm:$0xff]  ;;  %v1107_v39 = vld [vmem:[#allocation9 + $0x58] sm:$0xff]  ;;  %v1023_v21 = vsub.s32 1, %v3343_v20 }
 0x1f0   : > { %1134 = vmatprep.subr.mxu0 %v1121_v25  ;;  %v1106_v40 = vld [vmem:[#allocation9 + $0x50] sm:$0xff]  ;;  %v1105_v41 = vld [vmem:[#allocation9 + $0x48] sm:$0xff]  ;;  %v1104_v42 = vld [vmem:[#allocation9 + $0x40] sm:$0xff] }
 0x1f1   : > { %1135 = vmatpush1.msra.mxu0 %v1120_v26  ;;  %v1103_v43 = vld [vmem:[#allocation9 + $0x38] sm:$0xff]  ;;  %v1102_v44 = vld [vmem:[#allocation9 + $0x30] sm:$0xff]  ;;  %v1101_v45 = vld [vmem:[#allocation9 + $0x28] sm:$0xff] }
 0x1f2   : > { %1136 = vmatprep.subr.mxu0 %v1119_v27  ;;  %v1100_v46 = vld [vmem:[#allocation9 + $0x20] sm:$0xff]  ;;  %v1099_v47 = vld [vmem:[#allocation9 + $0x18] sm:$0xff]  ;;  %v1098_v48 = vld [vmem:[#allocation9 + $0x10] sm:$0xff] }
 0x1f3   : > { %1137 = vmatpush1.msra.mxu0 %v1118_v28  ;;  %v1097_v49 = vld [vmem:[#allocation9 + $0x8] sm:$0xff]  ;;  %v1096_v50 = vld [vmem:[#allocation9] sm:$0xff]  ;;  %v3275_v53 = vld [vmem:[%s3169_s7 + $0x10] sm:$0xff] }
 0x1f4   : > { %1138 = vmatprep.subr.mxu0 %v1117_v29  ;;  %v3265_v51 = vld [vmem:[%s3169_s7] sm:$0xff]  ;;  %v3270_v52 = vld [vmem:[%s3169_s7 + $0x8] sm:$0xff]  ;;  %v3280_v54 = vld [vmem:[%s3169_s7 + $0x18] sm:$0xff] }
 0x1f5   : > { %1139 = vmatpush1.msra.mxu0 %v1116_v30  ;;  %v3285_v55 = vld [vmem:[%s3169_s7 + $0x20] sm:$0xff]  ;;  %v3290_v56 = vld [vmem:[%s3169_s7 + $0x28] sm:$0xff]  ;;  %v3295_v57 = vld [vmem:[%s3169_s7 + $0x30] sm:$0xff] }
 0x1f6   : > { %1140 = vmatprep.subr.mxu0 %v1115_v31  ;;  %v3300_v58 = vld [vmem:[%s3169_s7 + $0x38] sm:$0xff]  ;;  %v3305_v59 = vld [vmem:[%s3169_s7 + $0x40] sm:$0xff]  ;;  %v3310_v60 = vld [vmem:[%s3169_s7 + $0x48] sm:$0xff] }
 0x1f7   : > { %1141 = vmatpush1.msra.mxu0 %v1114_v32  ;;  %v3315_v61 = vld [vmem:[%s3169_s7 + $0x50] sm:$0xff]  ;;  %v3320_v62 = vld [vmem:[%s3169_s7 + $0x58] sm:$0xff]  ;;  %v3325_v63 = vld [vmem:[%s3169_s7 + $0x60] sm:$0xff] }
 0x1f8   : > { %1142 = vmatprep.subr.mxu0 %v1113_v33  ;;  %v3330_v0 = vld [vmem:[%s3169_s7 + $0x68] sm:$0xff]  ;;  %v3335_v1 = vld [vmem:[%s3169_s7 + $0x70] sm:$0xff]  ;;  %v3340_v2 = vld [vmem:[%s3169_s7 + $0x78] sm:$0xff] }
 0x1f9   : > { %1143 = vmatpush1.msra.mxu0 %v1112_v34  ;;  %v1544_v3 = vld [vmem:[#allocation11 + $0x78] sm:$0xff]  ;;  %v1543_v4 = vld [vmem:[#allocation11 + $0x70] sm:$0xff]  ;;  %v1542_v6 = vld [vmem:[#allocation11 + $0x68] sm:$0xff] }
 0x1fa   : > { %1144 = vmatprep.subr.mxu0 %v1111_v35  ;;  %2147 = vmatprep.subr.mxu1 %v1544_v3  ;;  %v1541_v7 = vld [vmem:[#allocation11 + $0x60] sm:$0xff]  ;;  %v1540_v8 = vld [vmem:[#allocation11 + $0x58] sm:$0xff]  ;;  %v1539_v9 = vld [vmem:[#allocation11 + $0x50] sm:$0xff] }
 0x1fb   : > { %1145 = vmatpush1.msra.mxu0 %v1110_v36  ;;  %2148 = vmatpush3.msra.mxu1 %v1544_v3  ;;  %v1538_v10 = vld [vmem:[#allocation11 + $0x48] sm:$0xff]  ;;  %v1537_v11 = vld [vmem:[#allocation11 + $0x40] sm:$0xff]  ;;  %v1536_v12 = vld [vmem:[#allocation11 + $0x38] sm:$0xff] }
 0x1fc   : > { %1146 = vmatprep.subr.mxu0 %v1109_v37  ;;  %2149 = vmatprep.subr.mxu1 %v1543_v4  ;;  %v1535_v13 = vld [vmem:[#allocation11 + $0x30] sm:$0xff]  ;;  %v1534_v14 = vld [vmem:[#allocation11 + $0x28] sm:$0xff]  ;;  %v1533_v15 = vld [vmem:[#allocation11 + $0x20] sm:$0xff] }
 0x1fd   : > { %1147 = vmatpush1.msra.mxu0 %v1108_v38  ;;  %2150 = vmatpush3.msra.mxu1 %v1543_v4  ;;  %v1532_v16 = vld [vmem:[#allocation11 + $0x18] sm:$0xff]  ;;  %v1531_v17 = vld [vmem:[#allocation11 + $0x10] sm:$0xff]  ;;  %v1530_v5 = vld [vmem:[#allocation11 + $0x8] sm:$0xff] }
 0x1fe   : > { %1148 = vmatprep.subr.mxu0 %v1107_v39  ;;  %2151 = vmatprep.subr.mxu1 %v1542_v6  ;;  %v1529_v18 = vld [vmem:[#allocation11] sm:$0xff]  ;;  %v968_v24 = vld [vmem:[#allocation2 + $0xd0] sm:$0xff]  ;;  %v974_v32 = vld [vmem:[#allocation2 + $0x178] sm:$0xff] }
 0x1ff   : > { %1149 = vmatpush1.msra.mxu0 %v1106_v40  ;;  %2152 = vmatpush3.msra.mxu1 %v1542_v6  ;;  %v971_v27 = vld [vmem:[#allocation2 + $0x160] sm:$0xff]  ;;  %v977_v38 = vld [vmem:[#allocation2 + $0x90] sm:$0xff] }
 0x200   : > { %1150 = vmatprep.subr.mxu0 %v1105_v41  ;;  %2153 = vmatprep.subr.mxu1 %v1541_v7 }
 0x201   : > { %1151 = vmatpush1.msra.mxu0 %v1104_v42  ;;  %2154 = vmatpush3.msra.mxu1 %v1541_v7 }
 0x202   : > { %1152 = vmatprep.subr.mxu0 %v1103_v43  ;;  %2155 = vmatprep.subr.mxu1 %v1540_v8 }
 0x203   : > { %1153 = vmatpush1.msra.mxu0 %v1102_v44  ;;  %2156 = vmatpush3.msra.mxu1 %v1540_v8  ;;  %v980_v44 = vld [vmem:[#allocation2 + $0x100] sm:$0xff] }
 0x204   : > { %1154 = vmatprep.subr.mxu0 %v1101_v45  ;;  %2157 = vmatprep.subr.mxu1 %v1539_v9 }
 0x205   : > { %1155 = vmatpush1.msra.mxu0 %v1100_v46  ;;  %2158 = vmatpush3.msra.mxu1 %v1539_v9 }
 0x206   : > { %1156 = vmatprep.subr.mxu0 %v1099_v47  ;;  %2159 = vmatprep.subr.mxu1 %v1538_v10 }
 0x207   : > { %1157 = vmatpush1.msra.mxu0 %v1098_v48  ;;  %2160 = vmatpush3.msra.mxu1 %v1538_v10  ;;  %v986_v10 = vld [vmem:[#allocation2 + $0x120] sm:$0xff] }
 0x208   : > { %1158 = vmatprep.subr.mxu0 %v1097_v49  ;;  %2161 = vmatprep.subr.mxu1 %v1537_v11 }
 0x209   : > { %1159 = vmatpush1.msra.mxu0 %v1096_v50  ;;  %2162 = vmatpush3.msra.mxu1 %v1537_v11  ;;  %v983_v50 = vld [vmem:[#allocation2 + $0x80] sm:$0xff] }
 0x20a   : > { %1193 = vmatmul.mubr.f32.vlgmr.msra.gmra.mxu0 %v3265_v51  ;;  %2163 = vmatprep.subr.mxu1 %v1536_v12 }
 0x20b   : > { %1198 = vmatprep.mubr.f32.mxu0 %v2851_v22  ;;  %2164 = vmatpush3.msra.mxu1 %v1536_v12 }
 0x20c   : > { %2165 = vmatprep.subr.mxu1 %v1535_v13 }
 0x20d   : > { %2166 = vmatpush3.msra.mxu1 %v1535_v13 }
 0x20e   : > { %1199 = vmatmul.mubr.f32.gmra.mxu0 %v3270_v52  ;;  %2167 = vmatprep.subr.mxu1 %v1534_v14 }
 0x20f   : > { %1204 = vmatprep.mubr.f32.mxu0 %v2851_v22  ;;  %2168 = vmatpush3.msra.mxu1 %v1534_v14 }
 0x210   : > { %2169 = vmatprep.subr.mxu1 %v1533_v15 }
 0x211   : > { %2170 = vmatpush3.msra.mxu1 %v1533_v15 }
 0x212   : > { %1205 = vmatmul.mubr.f32.gmra.mxu0 %v3275_v53  ;;  %2171 = vmatprep.subr.mxu1 %v1532_v16 }
 0x213   : > { %1210 = vmatprep.mubr.f32.mxu0 %v2851_v22  ;;  %2172 = vmatpush3.msra.mxu1 %v1532_v16 }
 0x214   : > { %2173 = vmatprep.subr.mxu1 %v1531_v17 }
 0x215   : > { %2174 = vmatpush3.msra.mxu1 %v1531_v17 }
 0x216   : > { %1211 = vmatmul.mubr.f32.gmra.mxu0 %v3280_v54  ;;  %2175 = vmatprep.subr.mxu1 %v1530_v5 }
 0x217   : > { %1216 = vmatprep.mubr.f32.mxu0 %v2851_v22  ;;  %2176 = vmatpush3.msra.mxu1 %v1530_v5  ;;  %v989_v5 = vld [vmem:[#allocation2 + $0xb8] sm:$0xff] }
 0x218   : > { %2177 = vmatprep.subr.mxu1 %v1529_v18 }
 0x219   : > { %2178 = vmatpush3.msra.mxu1 %v1529_v18 }
 0x21a   : > { %1217 = vmatmul.mubr.f32.gmra.mxu0 %v3285_v55 }
 0x21b   : > { %1222 = vmatprep.mubr.f32.mxu0 %v2851_v22 }
 0x21e   : > { %1223 = vmatmul.mubr.f32.gmra.mxu0 %v3290_v56 }
 0x21f   : > { %1228 = vmatprep.mubr.f32.mxu0 %v2851_v22 }
 0x222   : > { %1229 = vmatmul.mubr.f32.gmra.mxu0 %v3295_v57 }
 0x223   : > { %1234 = vmatprep.mubr.f32.mxu0 %v2851_v22 }
 0x226   : > { %1235 = vmatmul.mubr.f32.gmra.mxu0 %v3300_v58 }
 0x227   : > { %1240 = vmatprep.mubr.f32.mxu0 %v2851_v22 }
 0x22a   : > { %1241 = vmatmul.mubr.f32.gmra.mxu0 %v3305_v59 }
 0x22b   : > { %1246 = vmatprep.mubr.f32.mxu0 %v2851_v22 }
 0x22e   : > { %1247 = vmatmul.mubr.f32.gmra.mxu0 %v3310_v60 }
 0x22f   : > { %1252 = vmatprep.mubr.f32.mxu0 %v2851_v22 }
 0x232   : > { %1253 = vmatmul.mubr.f32.gmra.mxu0 %v3315_v61 }
 0x233   : > { %1258 = vmatprep.mubr.f32.mxu0 %v2851_v22 }
 0x236   : > { %1259 = vmatmul.mubr.f32.gmra.mxu0 %v3320_v62 }
 0x237   : > { %1264 = vmatprep.mubr.f32.mxu0 %v2851_v22 }
 0x23a   : > { %1265 = vmatmul.mubr.f32.gmra.mxu0 %v3325_v63 }
 0x23b   : > { %1270 = vmatprep.mubr.f32.mxu0 %v2851_v22 }
 0x23e   : > { %1271 = vmatmul.mubr.f32.gmra.mxu0 %v3330_v0 }
 0x23f   : > { %1276 = vmatprep.mubr.f32.mxu0 %v2851_v22 }
 0x242   : > { %1277 = vmatmul.mubr.f32.gmra.mxu0 %v3335_v1 }
 0x243   : > { %1282 = vmatprep.mubr.f32.mxu0 %v2851_v22  ;;  %v3349_v22 = vld [vmem:[%s3662_s0] sm:$0x7] }
 0x244   : > { %v3352_v23 = vrot.slane %v3349_v22, %v1023_v21 }
 0x246   : > { %1283 = vmatmul.mubr.f32.gmra.mxu0 %v3340_v2  ;;  %v1033_v25 = vadd.f32 %v3352_v23, %v968_v24  ;;  %v1036_v30 = vadd.f32 %v3352_v23, %v971_v27  ;;  %v1039_v36 = vadd.f32 %v3352_v23, %v974_v32  ;;  %v1042_v42 = vadd.f32 %v3352_v23, %v977_v38 }
 0x247   : > { %v1045_v48 = vadd.f32 %v3352_v23, %v980_v44  ;;  %v1048_v7 = vadd.f32 %v3352_v23, %v983_v50  ;;  %v1051_v15 = vadd.f32 %v3352_v23, %v986_v10 }
 0x2ca   : > { %v3355_v26 = vpop.f32.mrf.mxu0 }
 0x2cc   : > { %v1196_v28 = vpop.f32.mrf.mxu0 }
 0x2cd   : > { %v1401_v29 = vadd.f32 %v1196_v28, %v1033_v25  ;;  %v1054_v25 = vadd.f32 %v3352_v23, %v989_v5 }
 0x2ce   : > { %v3358_v31 = vpop.f32.mrf.mxu0 }
 0x2cf   : > { %v2004_v33 = vmul.f32 -1.442695, %v1401_v29  ;;  %v992_v29 = vld [vmem:[#allocation2 + $0xf8] sm:$0xff] }
 0x2d0   : > { %v1202_v34 = vpop.f32.mrf.mxu0 }
 0x2d1   : > { %2375 = vpow2.f32 %v2004_v33  ;;  %v1402_v35 = vadd.f32 %v1202_v34, %v1036_v30 }
 0x2d2   : > { %v3361_v37 = vpop.f32.mrf.mxu0 }
 0x2d3   : > { %v2005_v39 = vmul.f32 -1.442695, %v1402_v35  ;;  %v1057_v35 = vadd.f32 %v3352_v23, %v992_v29 }
 0x2d4   : > { %v1208_v40 = vpop.f32.mrf.mxu0 }
 0x2d5   : > { %2377 = vpow2.f32 %v2005_v39  ;;  %v1403_v41 = vadd.f32 %v1208_v40, %v1039_v36  ;;  %v995_v39 = vld [vmem:[#allocation2 + $0xa0] sm:$0xff] }
 0x2d6   : > { %v3364_v43 = vpop.f32.mrf.mxu0 }
 0x2d7   : > { %v2006_v45 = vmul.f32 -1.442695, %v1403_v41 }
 0x2d8   : > { %v1214_v46 = vpop.f32.mrf.mxu0 }
 0x2d9   : > { %2379 = vpow2.f32 %v2006_v45  ;;  %v1404_v47 = vadd.f32 %v1214_v46, %v1042_v42  ;;  %v1060_v45 = vadd.f32 %v3352_v23, %v995_v39 }
 0x2da   : > { %v3367_v49 = vpop.f32.mrf.mxu0 }
 0x2db   : > { %v2007_v3 = vmul.f32 -1.442695, %v1404_v47 }
 0x2dc   : > { %v1220_v4 = vpop.f32.mrf.mxu0 }
 0x2dd   : > { %2381 = vpow2.f32 %v2007_v3  ;;  %v1405_v6 = vadd.f32 %v1220_v4, %v1045_v48  ;;  %v998_v48 = vld [vmem:[#allocation2 + $0x140] sm:$0xff] }
 0x2de   : > { %v2376_v8 = vpop.eup %2375  ;;  %v3370_v9 = vpop.f32.mrf.mxu0  ;;  %v1063_v10 = vadd.f32 %v3352_v23, %v998_v48 }
 0x2df   : > { %v1465_v11 = vadd.f32 1.0, %v2376_v8  ;;  %v2008_v12 = vmul.f32 -1.442695, %v1405_v6 }
 0x2e0   : > { %v1226_v13 = vpop.f32.mrf.mxu0 }
 0x2e1   : > { %2383 = vrcp.f32 %v1465_v11  ;;  %v1406_v14 = vadd.f32 %v1226_v13, %v1048_v7  ;;  %v1001_v13 = vld [vmem:[#allocation2 + $0x28] sm:$0xff] }
 0x2e2   : > { %v2378_v16 = vpop.eup %2377  ;;  %2385 = vpow2.f32 %v2008_v12  ;;  %v3373_v17 = vpop.f32.mrf.mxu0 }
 0x2e3   : > { %v1466_v18 = vadd.f32 1.0, %v2378_v16  ;;  %v2009_v19 = vmul.f32 -1.442695, %v1406_v14 }
 0x2e4   : > { %v1232_v21 = vpop.f32.mrf.mxu0 }
 0x2e5   : > { %2387 = vrcp.f32 %v1466_v18  ;;  %v1407_v24 = vadd.f32 %v1232_v21, %v1051_v15  ;;  %v1066_v21 = vadd.f32 %v3352_v23, %v1001_v13 }
 0x2e6   : > { %v2380_v27 = vpop.eup %2379  ;;  %2389 = vpow2.f32 %v2009_v19  ;;  %v3376_v28 = vpop.f32.mrf.mxu0 }
 0x2e7   : > { %v1467_v30 = vadd.f32 1.0, %v2380_v27  ;;  %v2010_v32 = vmul.f32 -1.442695, %v1407_v24  ;;  %v1004_v27 = vld [vmem:[#allocation2 + $0x18] sm:$0xff] }
 0x2e8   : > { %v1238_v33 = vpop.f32.mrf.mxu0 }
 0x2e9   : > { %2391 = vrcp.f32 %v1467_v30  ;;  %v1408_v34 = vadd.f32 %v1238_v33, %v1054_v25 }
 0x2ea   : > { %v2382_v36 = vpop.eup %2381  ;;  %2393 = vpow2.f32 %v2010_v32  ;;  %v3379_v38 = vpop.f32.mrf.mxu0 }
 0x2eb   : > { %v1468_v40 = vadd.f32 1.0, %v2382_v36  ;;  %v2011_v41 = vmul.f32 -1.442695, %v1408_v34  ;;  %v1069_v36 = vadd.f32 %v3352_v23, %v1004_v27 }
 0x2ec   : > { %v1244_v42 = vpop.f32.mrf.mxu0 }
 0x2ed   : > { %2395 = vrcp.f32 %v1468_v40  ;;  %v1409_v44 = vadd.f32 %v1244_v42, %v1057_v35 }
 0x2ee   : > { %v2384_v46 = vpop.eup %2383  ;;  %2397 = vpow2.f32 %v2011_v41  ;;  %v3382_v47 = vpop.f32.mrf.mxu0  ;;  %v1007_v41 = vld [vmem:[#allocation2] sm:$0xff] }
 0x2ef   : > { %v2386_v50 = vpop.eup %2385  ;;  %v2012_v3 = vmul.f32 -1.442695, %v1409_v44  ;;  %v1513_v4 = vmul.f32 %v2384_v46, %v3265_v51 }
 0x2f0   : > { %v1469_v6 = vadd.f32 1.0, %v2386_v50  ;;  %v1250_v7 = vpop.f32.mrf.mxu0 }
 0x2f1   : > { %2399 = vpow2.f32 %v2012_v3  ;;  %v1410_v8 = vadd.f32 %v1250_v7, %v1060_v45  ;;  %2179 = vmatprep.mubr.f32.mxu1 %v1513_v4  ;;  %v1072_v3 = vadd.f32 %v3352_v23, %v1007_v41  ;;  %v1010_v7 = vld [vmem:[#allocation2 + $0x68] sm:$0xff] }
 0x2f2   : > { %v2388_v11 = vpop.eup %2387  ;;  %2401 = vrcp.f32 %v1469_v6  ;;  %v3386_v12 = vpop.f32.mrf.mxu0 }
 0x2f3   : > { %v2390_v14 = vpop.eup %2389  ;;  %v2013_v15 = vmul.f32 -1.442695, %v1410_v8  ;;  %v1514_v16 = vmul.f32 %v2388_v11, %v3270_v52 }
 0x2f4   : > { %v1470_v5 = vadd.f32 1.0, %v2390_v14  ;;  %v1256_v18 = vpop.f32.mrf.mxu0 }
 0x2f5   : > { %2403 = vpow2.f32 %v2013_v15  ;;  %v1411_v19 = vadd.f32 %v1256_v18, %v1063_v10  ;;  %2180 = vmatmul.mubr.f32.vlgmr.msra.gmra.mxu1 %v1514_v16  ;;  %v1075_v16 = vadd.f32 %v3352_v23, %v1010_v7 }
 0x2f6   : > { %v2392_v24 = vpop.eup %2391  ;;  %2405 = vrcp.f32 %v1470_v5  ;;  %v3390_v25 = vpop.f32.mrf.mxu0 }
 0x2f7   : > { %v2394_v29 = vpop.eup %2393  ;;  %v2014_v30 = vmul.f32 -1.442695, %v1411_v19  ;;  %v1515_v32 = vmul.f32 %v2392_v24, %v3275_v53  ;;  %v1013_v19 = vld [vmem:[#allocation2 + $0x158] sm:$0xff] }
 0x2f8   : > { %v1471_v33 = vadd.f32 1.0, %v2394_v29  ;;  %v1262_v34 = vpop.f32.mrf.mxu0 }
 0x2f9   : > { %2407 = vpow2.f32 %v2014_v30  ;;  %v1412_v35 = vadd.f32 %v1262_v34, %v1066_v21  ;;  %2182 = vmatprep.mubr.f32.mxu1 %v1515_v32 }
 0x2fa   : > { %v2396_v39 = vpop.eup %2395  ;;  %2409 = vrcp.f32 %v1471_v33  ;;  %v3394_v40 = vpop.f32.mrf.mxu0  ;;  %v1078_v33 = vadd.f32 %v3352_v23, %v1013_v19 }
 0x2fb   : > { %v2398_v42 = vpop.eup %2397  ;;  %v2015_v44 = vmul.f32 -1.442695, %v1412_v35  ;;  %v1516_v45 = vmul.f32 %v2396_v39, %v3280_v54 }
 0x2fc   : > { %v1472_v46 = vadd.f32 1.0, %v2398_v42  ;;  %v1268_v48 = vpop.f32.mrf.mxu0 }
 0x2fd   : > { %2411 = vpow2.f32 %v2015_v44  ;;  %v1413_v50 = vadd.f32 %v1268_v48, %v1069_v36  ;;  %2183 = vmatmul.mubr.f32.gmra.mxu1 %v1516_v45 }
 0x2fe   : > { %v2400_v4 = vpop.eup %2399  ;;  %2413 = vrcp.f32 %v1472_v46  ;;  %v3398_v6 = vpop.f32.mrf.mxu0 }
 0x2ff   : > { %v2402_v8 = vpop.eup %2401  ;;  %v1473_v10 = vadd.f32 1.0, %v2400_v4  ;;  %v2016_v11 = vmul.f32 -1.442695, %v1413_v50 }
 0x300   : > { %v1274_v13 = vpop.f32.mrf.mxu0  ;;  %v1517_v14 = vmul.f32 %v2402_v8, %v3285_v55 }
 0x301   : > { %2415 = vrcp.f32 %v1473_v10  ;;  %v1414_v15 = vadd.f32 %v1274_v13, %v1072_v3 }
 0x302   : > { %v2404_v5 = vpop.eup %2403  ;;  %2417 = vpow2.f32 %v2016_v11  ;;  %2185 = vmatprep.mubr.f32.mxu1 %v1517_v14  ;;  %v3402_v18 = vpop.f32.mrf.mxu0 }
 0x303   : > { %v2406_v21 = vpop.eup %2405  ;;  %v1474_v24 = vadd.f32 1.0, %v2404_v5  ;;  %v2017_v27 = vmul.f32 -1.442695, %v1414_v15 }
 0x304   : > { %v1280_v29 = vpop.f32.mrf.mxu0  ;;  %v1518_v30 = vmul.f32 %v2406_v21, %v3290_v56 }
 0x305   : > { %2419 = vrcp.f32 %v1474_v24  ;;  %v1415_v32 = vadd.f32 %v1280_v29, %v1075_v16 }
 0x306   : > { %v2408_v34 = vpop.eup %2407  ;;  %2421 = vpow2.f32 %v2017_v27  ;;  %2186 = vmatmul.mubr.f32.gmra.mxu1 %v1518_v30  ;;  %v3406_v35 = vpop.f32.mrf.mxu0 }
 0x307   : > { %v2410_v36 = vpop.eup %2409  ;;  %v1475_v39 = vadd.f32 1.0, %v2408_v34  ;;  %v2018_v41 = vmul.f32 -1.442695, %v1415_v32 }
 0x308   : > { %v1286_v42 = vpop.f32.mrf.mxu0  ;;  %v1519_v44 = vmul.f32 %v2410_v36, %v3295_v57 }
 0x309   : > { %2423 = vrcp.f32 %v1475_v39  ;;  %v1416_v45 = vadd.f32 %v1286_v42, %v1078_v33  ;;  %v970_v39 = vld [vmem:[#allocation2 + $0x48] sm:$0xff] }
 0x30a   : > { %v2412_v46 = vpop.eup %2411  ;;  %2425 = vpow2.f32 %v2018_v41  ;;  %2188 = vmatprep.mubr.f32.mxu1 %v1519_v44 }
 0x30b   : > { %v2414_v48 = vpop.eup %2413  ;;  %v1476_v50 = vadd.f32 1.0, %v2412_v46  ;;  %v2019_v3 = vmul.f32 -1.442695, %v1416_v45  ;;  %v976_v45 = vld [vmem:[#allocation2 + $0x110] sm:$0xff]  ;;  %v973_v46 = vld [vmem:[#allocation2 + $0x40] sm:$0xff] }
 0x30c   : > { %v1520_v23 = vmul.f32 %v2414_v48, %v3300_v58 }
 0x30d   : > { %2427 = vrcp.f32 %v1476_v50 }
 0x30e   : > { %v2416_v4 = vpop.eup %2415  ;;  %2429 = vpow2.f32 %v2019_v3  ;;  %2189 = vmatmul.mubr.f32.gmra.mxu1 %v1520_v23 }
 0x30f   : > { %v2418_v7 = vpop.eup %2417  ;;  %v1521_v8 = vmul.f32 %v2416_v4, %v3305_v59 }
 0x310   : > { %v1477_v10 = vadd.f32 1.0, %v2418_v7  ;;  %v982_v7 = vld [vmem:[#allocation2 + $0xd8] sm:$0xff] }
 0x311   : > { %2191 = vmatprep.mubr.f32.mxu1 %v1521_v8 }
 0x312   : > { %v2420_v57 = vpop.eup %2419  ;;  %2431 = vrcp.f32 %v1477_v10  ;;  %v979_v10 = vld [vmem:[#allocation2 + $0x148] sm:$0xff] }
 0x313   : > { %v2422_v11 = vpop.eup %2421  ;;  %v1522_v13 = vmul.f32 %v2420_v57, %v3310_v60 }
 0x314   : > { %v1478_v14 = vadd.f32 1.0, %v2422_v11 }
 0x315   : > { %2192 = vmatmul.mubr.f32.gmra.mxu1 %v1522_v13  ;;  %v988_v13 = vld [vmem:[#allocation2 + $0xa8] sm:$0xff] }
 0x316   : > { %v2424_v15 = vpop.eup %2423  ;;  %2433 = vrcp.f32 %v1478_v14  ;;  %v1027_v14 = vsub.s32 2, %v3343_v20 }
 0x317   : > { %v2426_v16 = vpop.eup %2425  ;;  %v1523_v5 = vmul.f32 %v2424_v15, %v3315_v61  ;;  %v985_v15 = vld [vmem:[#allocation2 + $0x138] sm:$0xff] }
 0x318   : > { %v1479_v19 = vadd.f32 1.0, %v2426_v16 }
 0x319   : > { %2194 = vmatprep.mubr.f32.mxu1 %v1523_v5 }
 0x31a   : > { %v2428_v21 = vpop.eup %2427  ;;  %2435 = vrcp.f32 %v1479_v19  ;;  %v3437_v19 = vrot.slane %v3349_v22, %v1027_v14 }
 0x31b   : > { %v2430_v24 = vpop.eup %2429  ;;  %v1524_v59 = vmul.f32 %v2428_v21, %v3320_v62  ;;  %v1019_v62 = vsub.s32 0, %v3343_v20 }
 0x31c   : > { %v1480_v27 = vadd.f32 1.0, %v2430_v24 }
 0x31d   : > { %2195 = vmatmul.mubr.f32.gmra.mxu1 %v1524_v59  ;;  %v3420_v41 = vrot.slane %v3349_v22, %v1019_v62 }
 0x31e   : > { %2437 = vrcp.f32 %v1480_v27  ;;  %v972_v27 = vld [vmem:[#allocation2 + $0x128] sm:$0xff] }
 0x31f   : > { %v2432_v29 = vpop.eup %2431  ;;  %v1035_v42 = vadd.f32 %v3420_v41, %v970_v39  ;;  %v1038_v3 = vadd.f32 %v3420_v41, %v973_v46  ;;  %v1053_v5 = vadd.f32 %v3420_v41, %v988_v13  ;;  %v1050_v59 = vadd.f32 %v3420_v41, %v985_v15 }
 0x320   : > { %v1525_v60 = vmul.f32 %v2432_v29, %v3325_v63  ;;  %v967_v63 = vld [vmem:[#allocation2 + $0xb0] sm:$0xff]  ;;  %v994_v29 = vld [vmem:[#allocation2 + $0x88] sm:$0xff] }
 0x321   : > { %v1290_v44 = vadd.f32 %v3358_v31, %v1035_v42  ;;  %v1291_v4 = vadd.f32 %v3361_v37, %v1038_v3  ;;  %v1047_v31 = vadd.f32 %v3420_v41, %v982_v7  ;;  %v1296_v20 = vadd.f32 %v3376_v28, %v1053_v5 }
 0x322   : > { %2197 = vmatprep.mubr.f32.mxu1 %v1525_v60  ;;  %v969_v60 = vld [vmem:[#allocation2 + $0x10] sm:$0xff]  ;;  %v1059_v22 = vadd.f32 %v3420_v41, %v994_v29 }
 0x323   : > { %v2434_v30 = vpop.eup %2433  ;;  %v1989_v48 = vmul.f32 -1.442695, %v1290_v44  ;;  %v1990_v57 = vmul.f32 -1.442695, %v1291_v4  ;;  %v1294_v11 = vadd.f32 %v3370_v9, %v1047_v31  ;;  %v997_v4 = vld [vmem:[#allocation2 + $0xf0] sm:$0xff] }
 0x324   : > { %v1526_v32 = vmul.f32 %v2434_v30, %v3330_v0  ;;  %v1032_v0 = vadd.f32 %v3420_v41, %v967_v63  ;;  %v991_v30 = vld [vmem:[#allocation2 + $0xe8] sm:$0xff] }
 0x325   : > { %2439 = vpow2.f32 %v1989_v48  ;;  %v1993_v37 = vmul.f32 -1.442695, %v1294_v11  ;;  %v1056_v62 = vadd.f32 %v3420_v41, %v991_v30  ;;  %v1000_v48 = vld [vmem:[#allocation2 + $0xc8] sm:$0xff] }
 0x326   : > { %2198 = vmatmul.mubr.f32.gmra.mxu1 %v1526_v32  ;;  %v1037_v32 = vadd.f32 %v3437_v19, %v972_v27 }
 0x327   : > { %v2436_v33 = vpop.eup %2435  ;;  %v1297_v46 = vadd.f32 %v3379_v38, %v1056_v62  ;;  %v1062_v38 = vadd.f32 %v3420_v41, %v997_v4 }
 0x328   : > { %v1527_v61 = vmul.f32 %v2436_v33, %v3335_v1  ;;  %v1289_v1 = vadd.f32 %v3355_v26, %v1032_v0  ;;  %v1044_v26 = vadd.f32 %v3420_v41, %v979_v10  ;;  %v1295_v33 = vadd.f32 %v3373_v17, %v1050_v59 }
 0x329   : > { %v1298_v0 = vadd.f32 %v3382_v47, %v1059_v22  ;;  %v1065_v47 = vadd.f32 %v3420_v41, %v1000_v48  ;;  %v1299_v5 = vadd.f32 %v3386_v12, %v1062_v38  ;;  %v1012_v48 = vld [vmem:[#allocation2 + $0x30] sm:$0xff] }
 0x32a   : > { %2200 = vmatprep.mubr.f32.mxu1 %v1527_v61  ;;  %v1988_v50 = vmul.f32 -1.442695, %v1289_v1  ;;  %v1034_v61 = vadd.f32 %v3437_v19, %v969_v60  ;;  %v1994_v42 = vmul.f32 -1.442695, %v1295_v33 }
 0x32b   : > { %v2438_v34 = vpop.eup %2437  ;;  %v1300_v13 = vadd.f32 %v3390_v25, %v1065_v47  ;;  %v1998_v33 = vmul.f32 -1.442695, %v1299_v5  ;;  %v1009_v47 = vld [vmem:[#allocation2 + $0x50] sm:$0xff] }
 0x32c   : > { %v1528_v36 = vmul.f32 %v2438_v34, %v3340_v2  ;;  %v1041_v2 = vadd.f32 %v3420_v41, %v976_v45  ;;  %2441 = vpow2.f32 %v1988_v50  ;;  %v978_v45 = vld [vmem:[#allocation2 + $0x118] sm:$0xff] }
 0x32d   : > { %v1043_v3 = vadd.f32 %v3437_v19, %v978_v45  ;;  %v1999_v29 = vmul.f32 -1.442695, %v1300_v13  ;;  %v990_v45 = vld [vmem:[#allocation2 + $0x168] sm:$0xff] }
 0x32e   : > { %2201 = vmatmul.mubr.f32.gmra.mxu1 %v1528_v36  ;;  %v1292_v23 = vadd.f32 %v3364_v43, %v1041_v2  ;;  %v1293_v43 = vadd.f32 %v3367_v49, %v1044_v26  ;;  %v1995_v36 = vmul.f32 -1.442695, %v1296_v20  ;;  %v975_v2 = vld [vmem:[#allocation2 + $0x108] sm:$0xff] }
 0x32f   : > { %v1040_v7 = vadd.f32 %v3437_v19, %v975_v2  ;;  %v987_v2 = vld [vmem:[#allocation2 + $0xe0] sm:$0xff] }
 0x330   : > { %v1991_v8 = vmul.f32 -1.442695, %v1292_v23  ;;  %v1992_v24 = vmul.f32 -1.442695, %v1293_v43  ;;  %v1997_v23 = vmul.f32 -1.442695, %v1298_v0 }
 0x331   : > { %v984_v43 = vld [vmem:[#allocation2 + $0x130] sm:$0xff] }
 0x332   : > { %2443 = vpow2.f32 %v1991_v8  ;;  %v2440_v16 = vpop.eup %2439  ;;  %v1996_v8 = vmul.f32 -1.442695, %v1297_v46 }
 0x333   : > { %2445 = vpow2.f32 %v1990_v57  ;;  %v1354_v9 = vadd.f32 1.0, %v2440_v16 }
 0x334   : > { %2447 = vpow2.f32 %v1993_v37  ;;  %v1006_v37 = vld [vmem:[#allocation2 + $0x8] sm:$0xff] }
 0x335   : > { %2449 = vpow2.f32 %v1992_v24  ;;  %v981_v24 = vld [vmem:[#allocation2 + $0x58] sm:$0xff]  ;;  %v1071_v20 = vadd.f32 %v3420_v41, %v1006_v37  ;;  %v996_v37 = vld [vmem:[#allocation2 + $0x170] sm:$0xff] }
 0x336   : > { %2451 = vrcp.f32 %v1354_v9  ;;  %v1049_v9 = vadd.f32 %v3437_v19, %v984_v43  ;;  %v1046_v30 = vadd.f32 %v3437_v19, %v981_v24  ;;  %v1074_v43 = vadd.f32 %v3420_v41, %v1009_v47 }
 0x339   : > { %v2442_v21 = vpop.eup %2441 }
 0x33a   : > { %v1353_v49 = vadd.f32 1.0, %v2442_v21  ;;  %v1003_v21 = vld [vmem:[#allocation2 + $0xc0] sm:$0xff] }
 0x33c   : > { %2453 = vrcp.f32 %v1353_v49  ;;  %v1068_v49 = vadd.f32 %v3420_v41, %v1003_v21 }
 0x33e   : > { %v1301_v46 = vadd.f32 %v3394_v40, %v1068_v49  ;;  %v1052_v40 = vadd.f32 %v3437_v19, %v987_v2 }
 0x33f   : > { %v2444_v34 = vpop.eup %2443 }
 0x340   : > { %v2446_v63 = vpop.eup %2445  ;;  %v1356_v1 = vadd.f32 1.0, %v2444_v34  ;;  %v2000_v38 = vmul.f32 -1.442695, %v1301_v46 }
 0x341   : > { %v1355_v50 = vadd.f32 1.0, %v2446_v63  ;;  %v2448_v31 = vpop.eup %2447  ;;  %v1302_v63 = vadd.f32 %v3398_v6, %v1071_v20  ;;  %v1055_v6 = vadd.f32 %v3437_v19, %v990_v45 }
 0x342   : > { %v2450_v11 = vpop.eup %2449  ;;  %v1358_v16 = vadd.f32 1.0, %v2448_v31 }
 0x343   : > { %v2452_v15 = vpop.eup %2451  ;;  %v1357_v27 = vadd.f32 1.0, %v2450_v11  ;;  %v2001_v4 = vmul.f32 -1.442695, %v1302_v63 }
 0x344   : > { %v1739_v25 = vsub.f32 1.0, %v2452_v15  ;;  %v1723_v12 = vmul.f32 %v2452_v15, %v3270_v52 }
 0x349   : > { %v2454_v59 = vpop.eup %2453 }
 0x34a   : > { %v1722_v62 = vmul.f32 %v2454_v59, %v3265_v51 }
 0x3b5   : > { %v2181_v39 = vpop.f32.mrf.mxu1 }
 0x3b6   : > { %v1691_v28 = vadd.f32 %v2181_v39, %v1037_v32 }
 0x3b7   : > { %v1611_v44 = vpop.f32.mrf.mxu1 }
 0x3b8   : > { %2455 = vtanh.f32 %v1691_v28  ;;  %v1690_v17 = vadd.f32 %v1611_v44, %v1034_v61  ;;  %v1738_v61 = vsub.f32 1.0, %v2454_v59 }
 0x3b9   : > { %2457 = vpow2.f32 %v1995_v36 }
 0x3ba   : > { %2459 = vtanh.f32 %v1690_v17 }
 0x3bb   : > { %2461 = vpow2.f32 %v1994_v42 }
 0x3bc   : > { %2463 = vrcp.f32 %v1356_v1 }
 0x3bd   : > { %v2184_v10 = vpop.f32.mrf.mxu1  ;;  %2465 = vrcp.f32 %v1355_v50 }
 0x3be   : > { %v1693_v57 = vadd.f32 %v2184_v10, %v1043_v3  ;;  %2467 = vpow2.f32 %v1997_v23  ;;  %v1077_v10 = vadd.f32 %v3420_v41, %v1012_v48 }
 0x3bf   : > { %v1621_v26 = vpop.f32.mrf.mxu1 }
 0x3c0   : > { %2469 = vtanh.f32 %v1693_v57  ;;  %v1692_v14 = vadd.f32 %v1621_v26, %v1040_v7 }
 0x3c1   : > { %2471 = vpow2.f32 %v1996_v8 }
 0x3c2   : > { %2473 = vtanh.f32 %v1692_v14 }
 0x3c3   : > { %2475 = vrcp.f32 %v1358_v16 }
 0x3c4   : > { %2477 = vrcp.f32 %v1357_v27 }
 0x3c5   : > { %v2456_v60 = vpop.eup %2455  ;;  %2479 = vpow2.f32 %v1999_v29 }
 0x3c6   : > { %v2458_v32 = vpop.eup %2457  ;;  %v1755_v22 = vmul.f32 %v2456_v60, %v1739_v25  ;;  %v2187_v34 = vpop.f32.mrf.mxu1  ;;  %v1303_v25 = vadd.f32 %v3402_v18, %v1074_v43 }
 0x3c7   : > { %v2460_v36 = vpop.eup %2459  ;;  %v1695_v39 = vadd.f32 %v2187_v34, %v1049_v9  ;;  %v1360_v17 = vadd.f32 1.0, %v2458_v32  ;;  %v993_v9 = vld [vmem:[#allocation2 + $0x20] sm:$0xff] }
 0x3c8   : > { %v2462_v28 = vpop.eup %2461  ;;  %v1771_v42 = vadd.f32 %v1755_v22, %v1723_v12  ;;  %v1754_v0 = vmul.f32 %v2460_v36, %v1738_v61  ;;  %v1631_v44 = vpop.f32.mrf.mxu1  ;;  %v1058_v49 = vadd.f32 %v3437_v19, %v993_v9  ;;  %v2002_v34 = vmul.f32 -1.442695, %v1303_v25 }
 0x3c9   : > { %v2464_v1 = vpop.eup %2463  ;;  %2481 = vtanh.f32 %v1695_v39  ;;  %v1694_v52 = vadd.f32 %v1631_v44, %v1046_v30  ;;  %v1359_v3 = vadd.f32 1.0, %v2462_v28  ;;  %v1002_v28 = vld [vmem:[#allocation2 + $0x38] sm:$0xff] }
 0x3ca   : > { %2483 = vpow2.f32 %v1998_v33  ;;  %1787 = vst [vmem:[%s3179_s30 + $0x8] sm:$0xff] %v1771_v42  ;;  %v1770_v51 = vadd.f32 %v1754_v0, %v1722_v62  ;;  %v2466_v50 = vpop.eup %2465  ;;  %v1741_v7 = vsub.f32 1.0, %v2464_v1  ;;  %v1725_v57 = vmul.f32 %v2464_v1, %v3280_v54 }
 0x3cb   : > { %2485 = vtanh.f32 %v1694_v52  ;;  %v2468_v23 = vpop.eup %2467  ;;  %v1740_v11 = vsub.f32 1.0, %v2466_v50  ;;  %v1724_v15 = vmul.f32 %v2466_v50, %v3275_v53  ;;  %v1304_v54 = vadd.f32 %v3406_v35, %v1077_v10 }
 0x3cc   : > { %1786 = vst [vmem:[%s3179_s30] sm:$0xff] %v1770_v51  ;;  %2487 = vrcp.f32 %v1360_v17  ;;  %v1362_v5 = vadd.f32 1.0, %v2468_v23  ;;  %v1061_v53 = vadd.f32 %v3437_v19, %v996_v37  ;;  %v999_v17 = vld [vmem:[#allocation2 + $0x60] sm:$0xff] }
 0x3cd   : > { %v2470_v8 = vpop.eup %2469  ;;  %2489 = vrcp.f32 %v1359_v3  ;;  %v2003_v35 = vmul.f32 -1.442695, %v1304_v54  ;;  %v1064_v2 = vadd.f32 %v3437_v19, %v999_v17 }
 0x3ce   : > { %v2472_v31 = vpop.eup %2471  ;;  %v1757_v26 = vmul.f32 %v2470_v8, %v1741_v7  ;;  %v2190_v13 = vpop.f32.mrf.mxu1  ;;  %2491 = vpow2.f32 %v2001_v4 }
 0x3cf   : > { %v2474_v14 = vpop.eup %2473  ;;  %v1697_v16 = vadd.f32 %v2190_v13, %v1055_v6  ;;  %v1361_v20 = vadd.f32 1.0, %v2472_v31  ;;  %v2535_v13 = vld [vmem:[%s3169_s7 + $0x30] sm:$0xff] }
 0x3d0   : > { %v1773_v21 = vadd.f32 %v1757_v26, %v1725_v57  ;;  %v1756_v24 = vmul.f32 %v2474_v14, %v1740_v11  ;;  %v1641_v59 = vpop.f32.mrf.mxu1  ;;  %v2476_v29 = vpop.eup %2475 }
 0x3d1   : > { %2493 = vtanh.f32 %v1697_v16  ;;  %v1696_v27 = vadd.f32 %v1641_v59, %v1052_v40  ;;  %v2478_v60 = vpop.eup %2477  ;;  %v1743_v32 = vsub.f32 1.0, %v2476_v29  ;;  %v1727_v36 = vmul.f32 %v2476_v29, %v3290_v56 }
 0x3d2   : > { %2495 = vpow2.f32 %v2000_v38  ;;  %1789 = vst [vmem:[%s3179_s30 + $0x18] sm:$0xff] %v1773_v21  ;;  %v1772_v41 = vadd.f32 %v1756_v24, %v1724_v15  ;;  %v2480_v30 = vpop.eup %2479  ;;  %v1742_v39 = vsub.f32 1.0, %v2478_v60  ;;  %v1726_v45 = vmul.f32 %v2478_v60, %v3285_v55  ;;  %v1008_v38 = vld [vmem:[#allocation2 + $0x78] sm:$0xff] }
 0x3d3   : > { %2497 = vtanh.f32 %v1696_v27  ;;  %v1364_v42 = vadd.f32 1.0, %v2480_v30  ;;  %v1067_v56 = vadd.f32 %v3437_v19, %v1002_v28  ;;  %v1005_v15 = vld [vmem:[#allocation2 + $0x98] sm:$0xff]  ;;  %v2536_v27 = vld [vmem:[%s3169_s7 + $0x48] sm:$0xff]  ;;  %v2537_v30 = vld [vmem:[%s3169_s7 + $0x40] sm:$0xff] }
 0x3d4   : > { %2499 = vrcp.f32 %v1362_v5  ;;  %1788 = vst [vmem:[%s3179_s30 + $0x10] sm:$0xff] %v1772_v41  ;;  %v1073_v5 = vadd.f32 %v3437_v19, %v1008_v38  ;;  %v1070_v59 = vadd.f32 %v3437_v19, %v1005_v15 }
 0x3d5   : > { %v2193_v33 = vpop.f32.mrf.mxu1  ;;  %2501 = vrcp.f32 %v1361_v20 }
 0x3d6   : > { %v2482_v12 = vpop.eup %2481  ;;  %v1699_v22 = vadd.f32 %v2193_v33, %v1061_v53 }
 0x3d7   : > { %v2484_v61 = vpop.eup %2483  ;;  %v1759_v62 = vmul.f32 %v2482_v12, %v1743_v32  ;;  %v1651_v18 = vpop.f32.mrf.mxu1  ;;  %v1014_v12 = vld [vmem:[#allocation2 + $0x150] sm:$0xff] }
 0x3d8   : > { %v2486_v63 = vpop.eup %2485  ;;  %2503 = vtanh.f32 %v1699_v22  ;;  %v1698_v0 = vadd.f32 %v1651_v18, %v1058_v49  ;;  %v1363_v46 = vadd.f32 1.0, %v2484_v61  ;;  %v1079_v28 = vadd.f32 %v3437_v19, %v1014_v12 }
 0x3d9   : > { %2505 = vpow2.f32 %v2003_v35  ;;  %v1775_v44 = vadd.f32 %v1759_v62, %v1727_v36  ;;  %v1758_v1 = vmul.f32 %v2486_v63, %v1742_v39  ;;  %v2488_v52 = vpop.eup %2487  ;;  %v1011_v62 = vld [vmem:[#allocation2 + $0x70] sm:$0xff] }
 0x3da   : > { %2507 = vtanh.f32 %v1698_v0  ;;  %v2490_v51 = vpop.eup %2489  ;;  %v1745_v3 = vsub.f32 1.0, %v2488_v52  ;;  %v1729_v47 = vmul.f32 %v2488_v52, %v3300_v58  ;;  %v1076_v0 = vadd.f32 %v3437_v19, %v1011_v62 }
 0x3db   : > { %2509 = vpow2.f32 %v2002_v34  ;;  %1791 = vst [vmem:[%s3179_s30 + $0x28] sm:$0xff] %v1775_v44  ;;  %v1774_v48 = vadd.f32 %v1758_v1, %v1726_v45  ;;  %v2492_v50 = vpop.eup %2491  ;;  %v1744_v8 = vsub.f32 1.0, %v2490_v51  ;;  %v1728_v14 = vmul.f32 %v2535_v13, %v2490_v51  ;;  %v2538_v44 = vld [vmem:[%s3169_s7 + $0x58] sm:$0xff]  ;;  %v2539_v51 = vld [vmem:[%s3169_s7 + $0x50] sm:$0xff] }
 0x3dc   : > { %2511 = vrcp.f32 %v1364_v42  ;;  %v1366_v26 = vadd.f32 1.0, %v2492_v50 }
 0x3dd   : > { %1790 = vst [vmem:[%s3179_s30 + $0x20] sm:$0xff] %v1774_v48  ;;  %v2196_v6 = vpop.f32.mrf.mxu1  ;;  %2513 = vrcp.f32 %v1363_v46 }
 0x3de   : > { %v2494_v55 = vpop.eup %2493  ;;  %v1701_v23 = vadd.f32 %v2196_v6, %v1067_v56 }
 0x3df   : > { %v2496_v4 = vpop.eup %2495  ;;  %v1761_v7 = vmul.f32 %v2494_v55, %v1745_v3  ;;  %v1661_v10 = vpop.f32.mrf.mxu1 }
 0x3e0   : > { %v2498_v40 = vpop.eup %2497  ;;  %2515 = vtanh.f32 %v1701_v23  ;;  %v1700_v31 = vadd.f32 %v1661_v10, %v1064_v2  ;;  %v1365_v58 = vadd.f32 1.0, %v2496_v4 }
 0x3e1   : > { %v2500_v57 = vpop.eup %2499  ;;  %v1777_v11 = vadd.f32 %v1761_v7, %v1729_v47  ;;  %v1760_v43 = vmul.f32 %v2498_v40, %v1744_v8  ;;  %v2540_v7 = vld [vmem:[%s3169_s7 + $0x68] sm:$0xff] }
 0x3e2   : > { %2517 = vtanh.f32 %v1700_v31  ;;  %v2502_v16 = vpop.eup %2501  ;;  %v1747_v21 = vsub.f32 1.0, %v2500_v57  ;;  %v1731_v9 = vmul.f32 %v2536_v27, %v2500_v57  ;;  %v2541_v57 = vld [vmem:[%s3169_s7 + $0x60] sm:$0xff] }
 0x3e3   : > { %1793 = vst [vmem:[%s3179_s30 + $0x38] sm:$0xff] %v1777_v11  ;;  %v1776_v37 = vadd.f32 %v1760_v43, %v1728_v14  ;;  %2519 = vrcp.f32 %v1366_v26  ;;  %v1746_v20 = vsub.f32 1.0, %v2502_v16  ;;  %v1730_v35 = vmul.f32 %v2537_v30, %v2502_v16 }
 0x3e4   : > { %2521 = vrcp.f32 %v1365_v58  ;;  %v2542_v58 = vld [vmem:[%s3169_s7 + $0x78] sm:$0xff] }
 0x3e5   : > { %v2504_v24 = vpop.eup %2503  ;;  %1792 = vst [vmem:[%s3179_s30 + $0x30] sm:$0xff] %v1776_v37 }
 0x3e6   : > { %v2506_v54 = vpop.eup %2505  ;;  %v1763_v29 = vmul.f32 %v2504_v24, %v1747_v21  ;;  %v2199_v41 = vpop.f32.mrf.mxu1 }
 0x3e7   : > { %v2508_v53 = vpop.eup %2507  ;;  %v1703_v25 = vadd.f32 %v2199_v41, %v1073_v5  ;;  %v1368_v61 = vadd.f32 1.0, %v2506_v54  ;;  %v2543_v54 = vld [vmem:[%s3169_s7 + $0x70] sm:$0xff] }
 0x3e8   : > { %v2510_v60 = vpop.eup %2509  ;;  %v1779_v49 = vadd.f32 %v1763_v29, %v1731_v9  ;;  %v1762_v32 = vmul.f32 %v2508_v53, %v1746_v20  ;;  %v1671_v33 = vpop.f32.mrf.mxu1 }
 0x3e9   : > { %v2512_v22 = vpop.eup %2511  ;;  %2523 = vtanh.f32 %v1703_v25  ;;  %v1702_v34 = vadd.f32 %v1671_v33, %v1070_v59  ;;  %v1367_v18 = vadd.f32 1.0, %v2510_v60 }
 0x3ea   : > { %1795 = vst [vmem:[%s3179_s30 + $0x48] sm:$0xff] %v1779_v49  ;;  %v1778_v36 = vadd.f32 %v1762_v32, %v1730_v35  ;;  %v2514_v39 = vpop.eup %2513  ;;  %v1749_v63 = vsub.f32 1.0, %v2512_v22  ;;  %v1733_v45 = vmul.f32 %v2538_v44, %v2512_v22 }
 0x3eb   : > { %2525 = vtanh.f32 %v1702_v34  ;;  %v1748_v17 = vsub.f32 1.0, %v2514_v39  ;;  %v1732_v2 = vmul.f32 %v2539_v51, %v2514_v39 }
 0x3ec   : > { %1794 = vst [vmem:[%s3179_s30 + $0x40] sm:$0xff] %v1778_v36  ;;  %2527 = vrcp.f32 %v1368_v61 }
 0x3ed   : > { %v2516_v42 = vpop.eup %2515  ;;  %2529 = vrcp.f32 %v1367_v18 }
 0x3ee   : > { %v1765_v1 = vmul.f32 %v2516_v42, %v1749_v63  ;;  %v2202_v52 = vpop.f32.mrf.mxu1 }
 0x3ef   : > { %v2518_v46 = vpop.eup %2517  ;;  %v1705_v56 = vadd.f32 %v2202_v52, %v1079_v28 }
 0x3f0   : > { %v1781_v48 = vadd.f32 %v1765_v1, %v1733_v45  ;;  %v1764_v50 = vmul.f32 %v2518_v46, %v1748_v17  ;;  %v1681_v3 = vpop.f32.mrf.mxu1  ;;  %v2520_v19 = vpop.eup %2519 }
 0x3f1   : > { %2531 = vtanh.f32 %v1705_v56  ;;  %v1704_v6 = vadd.f32 %v1681_v3, %v1076_v0  ;;  %v2522_v23 = vpop.eup %2521  ;;  %v1751_v4 = vsub.f32 1.0, %v2520_v19  ;;  %v1735_v8 = vmul.f32 %v2540_v7, %v2520_v19 }
 0x3f2   : > { %1797 = vst [vmem:[%s3179_s30 + $0x58] sm:$0xff] %v1781_v48  ;;  %v1780_v55 = vadd.f32 %v1764_v50, %v1732_v2  ;;  %v1750_v40 = vsub.f32 1.0, %v2522_v23  ;;  %v1734_v26 = vmul.f32 %v2541_v57, %v2522_v23 }
 0x3f3   : > { %2533 = vtanh.f32 %v1704_v6 }
 0x3f4   : > { %1796 = vst [vmem:[%s3179_s30 + $0x50] sm:$0xff] %v1780_v55 }
 0x3f6   : > { %v2524_v47 = vpop.eup %2523 }
 0x3f7   : > { %v1767_v10 = vmul.f32 %v2524_v47, %v1751_v4 }
 0x3f8   : > { %v2526_v31 = vpop.eup %2525 }
 0x3f9   : > { %v1783_v38 = vadd.f32 %v1767_v10, %v1735_v8  ;;  %v1766_v11 = vmul.f32 %v2526_v31, %v1750_v40  ;;  %v2528_v13 = vpop.eup %2527 }
 0x3fa   : > { %v2530_v43 = vpop.eup %2529  ;;  %v1753_v15 = vsub.f32 1.0, %v2528_v13  ;;  %v1737_v37 = vmul.f32 %v2542_v58, %v2528_v13 }
 0x3fb   : > { %1799 = vst [vmem:[%s3179_s30 + $0x68] sm:$0xff] %v1783_v38  ;;  %v1782_v14 = vadd.f32 %v1766_v11, %v1734_v26  ;;  %v1752_v21 = vsub.f32 1.0, %v2530_v43  ;;  %v1736_v27 = vmul.f32 %v2543_v54, %v2530_v43 }
 0x3fd   : > { %1798 = vst [vmem:[%s3179_s30 + $0x60] sm:$0xff] %v1782_v14 }
 0x3fe   : > { %v2532_v16 = vpop.eup %2531 }
 0x3ff   : > { %v1769_v5 = vmul.f32 %v2532_v16, %v1753_v15 }
 0x400   : > { %v2534_v24 = vpop.eup %2533 }
 0x401   : > { %v1785_v59 = vadd.f32 %v1769_v5, %v1737_v37  ;;  %v1768_v9 = vmul.f32 %v2534_v24, %v1752_v21 }
 0x403   : > { %1801 = vst [vmem:[%s3179_s30 + $0x78] sm:$0xff] %v1785_v59  ;;  %v1784_v29 = vadd.f32 %v1768_v9, %v1736_v27 }
 0x405   : > { %1800 = vst [vmem:[%s3179_s30 + $0x70] sm:$0xff] %v1784_v29 }
 0x406 PF: > { %s3663_s12 = sld [smem:[#allocation21_spill]]  ;;  %s1816_s15 = sshll.u32 %s3179_s30, 4  ;;  %s3513_s15 = int_to_ptr.vmem [resolvable:$true] %s1816_s15 }
 0x407   : > { %s3664_s24 = sld [smem:[#allocation30_spill]]  ;;  %s3517_s7 = scalar_lea.sflag [#allocation5], %s344_s16 }
 0x408   : > { %s2680_s13 = scalar_lea.vmem %s3513_s15, 2048  ;;  %p3666_p8 = scmp.ne.s32.totalorder %s3649_s5, 0 }
 0x409   : > { %p2681_p11 = scmp.ne.s32.totalorder %s3513_s15, %s2680_s13  ;;  %s2852_s11 = smov [#allocation12]  }
 0x40a   : > { %s2684_s27 = sshll.u32 %s2852_s11, 4  ;;  %s2685_s27 = int_to_ptr.vmem [resolvable:$false] %s2684_s27 }
 0x40b   : > { %p2682_p2 = pnand %p2681_p11, %p3666_p8  ;;  %s2686_s3 = scalar_lea.vmem %s2685_s27, 4096 }
 0x40c   : > { %s2026_s19 = sshll.u32 %s3663_s12, 11  ;;  %p2687_p6 = scmp.lt.s32.totalorder %s3513_s15, %s2685_s27 }
 0x40d   : > { %s3665_s17 = smov %s3664_s24  ;;  %s3510_s26 = scalar_lea.hbm %s3664_s24, %s2026_s19 }
 0x40e   : > { %p2683_p3 = pneg %p2682_p2  ;;  %p2688_p1 = scmp.lt.s32.totalorder %s2686_s3, %s2680_s13 }
 0x410   : > { %p2689_p5 = por %p2688_p1, %p2687_p6 }
 0x412   : > { %p2690_p7 = pnand %p2689_p5, %p2683_p3 }
 0x414   : > { %2693 = shalt.err (!%p2690_p7)
}
 0x415   : > { %s2694_s16 = scalar_lea.hbm %s3510_s26, 2048  ;;  %s2698_s12 = scalar_lea.hbm %s3665_s17, 6144 }
 0x416   : > { %p2695_p9 = scmp.ne.s32.totalorder %s3510_s26, %s2694_s16  ;;  %p2699_p12 = scmp.lt.s32.totalorder %s3510_s26, %s3665_s17 }
 0x417   : > { %p2700_p0 = scmp.lt.s32.totalorder %s2698_s12, %s2694_s16 }
 0x418   : > { %p2696_p4 = pnand %p2695_p9, %p3666_p8 }
 0x419   : > { %p2701_p10 = por %p2700_p0, %p2699_p12 }
 0x41a   : > { %p2697_p13 = pneg %p2696_p4 }
 0x41c   : > { %p2702_p11 = pnand %p2701_p10, %p2697_p13 }
 0x41e   : > { %2705 = shalt.err (!%p2702_p11)
}
 0x41f   : > { %s2853_s25 = smov 128   ;;  %s2854_s24 = smov 8  }
 0x420   : > { %2221 = dma.vmem_to_hbm [thread:$0]  (%p3666_p8), %s3513_s15, 2048, %s3510_s26, %s3517_s7, %s2853_s25, %s2853_s25, %s2854_s24  }
 0x421 PF: > { %p2249_p2 = scmp.ge.s32.totalorder %s2836_s10, 2  ;;  %s1831_s13 = sand.u32 1, %s2784_s21  }
 0x422   : > { %p3667_p3 = scmp.ne.s32.totalorder %s3650_s18, 0  ;;  %s1832_s11 = scalar_lea.sflag [#allocation5], %s1831_s13 }
 0x424   : > { %p2241_p6 = pnand %p2249_p2, %p3667_p3 }
 0x426   : > { %p2242_p1 = pneg %p2241_p6 }
 0x428   : > { %2779 = dma.done.wait (%p2242_p1), %s1832_s11, 2048  }
 0x429   : > { %2781 = vsyncadd (%p2242_p1), %s1832_s11, 4294965248  ;;  %s26_s10 = sadd.s32 1, %s2836_s10   ;;  %s3669_s24 = sld [smem:[#allocation18_spill]] }
 0x42a   : > { %p3545_p5 = scmp.ge.s32.totalorder %s26_s10, 11   ;;  %s3670_s25 = sld [smem:[#allocation19_spill]] }
 0x42b   : > { %s3671_s26 = sld [smem:[#allocation25_spill]]  ;;  %s3675_s21 = smov %s2788_s22 }
 0x42c   : > { %s3672_s5 = sld [smem:[#allocation23_spill]]  ;;  %s3676_s22 = smov %s2792_s23 }
 0x42d   : > { %s3673_s18 = sld [smem:[#allocation24_spill]]  ;;  %s3677_s23 = smov %s3106_s6 }
 0x42e   : > { %s3678_s27 = smov %s2812_s28  ;;  %s3679_s28 = smov %s2816_s29 }
 0x42f   : > { %s3680_s29 = smov %s3068_s20  ;;  %s3681_s30 = smov %s2828_s8 }
 0x430   : > { %s3682_s7 = smov %s2832_s9  ;;  %25 = sbr.rel (!%p3545_p5) target bundleno = 18 (0x12), region = 129 }
 0x432   : > { %s3683_s8 = smov %s3672_s5 }
 0x433   : > { %s3684_s9 = smov %s3673_s18 }
 0x435   :  { %1837 = vsyncpa [#allocation4], 1 }
 0x436   :  { %1839 = vsyncpa [#allocation4 + $0x1], 1 }
 0x437   :  { %1840 = vsyncpa [#allocation7], 1 }
 0x438   :  { %1842 = vsyncpa [#allocation7 + $0x1], 1 }
 0x439   :  { %1843 = vsyncpa [#allocation10], 1 }
 0x43a   :  { %1844 = vsyncpa [#allocation5], 1 }
 0x43b   :  { %1846 = vsyncpa [#allocation5 + $0x1], 1 }

</bundles_post_ra>
